<compile_context>
chip_gen: v6e
topology: v6e:2x2x1
jax: 0.10.0
libtpu: 0.0.40
codegen_flags: <defaults>
</compile_context>

<pallas_src>
import jax
import jax.numpy as jnp
from jax import lax
from jax.experimental import pallas as pl
from jax.experimental.pallas import tpu as pltpu

LN_EPS = 1e-5
_DEFAULT_TILE_M = 512   # 256-512 is the sweet spot across v5e/v6e/v7x
_LANE = 128
_SUBLANE = 8


def _cdiv(a, b):
    return -(-a // b)


def _round_up(x, m):
    return (x + m - 1) // m * m


def _gelu_exact(x):
    # Exact (erf-based) GELU, matching torch.nn.functional.gelu default.
    return 0.5 * x * (1.0 + lax.erf(x * 0.7071067811865476))


def _head_kernel(x_ref, w1_ref, w2_ref, gamma_ref, beta_ref, o_ref):
    # x_ref:     [TILE_M, dim_in]    f32 activations (backbone features)
    # w1_ref:    [dim_in, dim_out]   bf16 (pre-transposed nn.Linear weight)
    # w2_ref:    [dim_out, dim_out]  bf16 (pre-transposed nn.Linear weight)
    # gamma_ref: [1, dim_out]        f32
    # beta_ref:  [1, dim_out]        f32
    # o_ref:     [TILE_M, dim_out]
    #
    # MXU operands in bf16 (native MXU dtype on every generation), f32 accumulate.
    x_bf = x_ref[...].astype(jnp.bfloat16)
    y1 = jnp.dot(x_bf, w1_ref[...], preferred_element_type=jnp.float32)

    # dropout -> identity (inference); exact GELU in f32 (v5e-safe elementwise)
    h = _gelu_exact(y1)
    y2 = jnp.dot(h.astype(jnp.bfloat16), w2_ref[...],
                 preferred_element_type=jnp.float32)
    # dropout -> identity (inference)
    z = y1 + y2

    # LayerNorm over the feature dim — two-pass mean/var (torch semantics), f32.
    d = z.shape[-1]
    inv_d = jnp.float32(1.0 / d)
    mean = jnp.sum(z, axis=-1, keepdims=True) * inv_d
    c = z - mean
    var = jnp.sum(c * c, axis=-1, keepdims=True) * inv_d
    inv = lax.rsqrt(var + LN_EPS)
    emb = c * inv * gamma_ref[...] + beta_ref[...]

    # L2-normalize along the feature dim (ImageEmbeddingExtractor tail).
    # Tiny eps guards all-zero / masked ragged rows against NaN.
    sq = jnp.sum(emb * emb, axis=-1, keepdims=True)
    emb = emb * lax.rsqrt(jnp.maximum(sq, jnp.float32(1e-12)))

    o_ref[...] = emb.astype(o_ref.dtype)


def prepare_head_params(w1, w2, gamma, beta):
    """One-time parameter prep: transpose the nn.Linear weights and cast them to
    bf16 for the MXU (hoisted out of the per-call path).

    w1: [dim_out, dim_in]   (torch nn.Linear weight layout)
    w2: [dim_out, dim_out]
    gamma, beta: [dim_out]
    """
    dim_out, dim_in = w1.shape
    w1_t = jnp.transpose(w1).astype(jnp.bfloat16)   # [dim_in, dim_out]
    w2_t = jnp.transpose(w2).astype(jnp.bfloat16)   # [dim_out, dim_out]
    gamma2d = gamma.astype(jnp.float32).reshape(1, dim_out)
    beta2d = beta.astype(jnp.float32).reshape(1, dim_out)
    return w1_t, w2_t, gamma2d, beta2d


def image_embedding_head(x, params, *, tile_m=_DEFAULT_TILE_M):
    """EmbeddingMapper + L2-normalization tail of ImageEmbeddingExtractor.

    x:      [..., dim_in] backbone features (e.g. resnet50 logits, dim_in=1000)
    params: output of prepare_head_params
    Returns [..., dim_out] unit-norm embeddings.
    """
    w1_t, w2_t, gamma2d, beta2d = params
    dim_in, dim_out = w1_t.shape
    assert x.shape[-1] == dim_in

    lead = x.shape[:-1]
    M = 1
    for d in lead:
        M *= d
    M = max(M, 1)
    x2d = x.reshape(M, dim_in)

    # Tile over the token dim.  Clamp so the 'parallel' grid has >= 2 blocks
    # whenever possible (keeps both v7x TensorCores busy); keep tile_m a
    # multiple of 8 (sublane).  Ragged last block is masked by Pallas — no
    # host-side pad or trailing slice needed.
    tile_m = min(tile_m, _round_up(_cdiv(M, 2), _SUBLANE))
    tile_m = max(_SUBLANE, _round_up(tile_m, _SUBLANE))
    grid_m = _cdiv(M, tile_m)

    flops = (2 * M * dim_in * dim_out
             + 2 * M * dim_out * dim_out
             + 14 * M * dim_out)
    bytes_accessed = (4 * M * dim_in          # x (f32)
                      + 2 * dim_in * dim_out  # w1 (bf16)
                      + 2 * dim_out * dim_out # w2 (bf16)
                      + 8 * dim_out           # gamma, beta (f32)
                      + 4 * M * dim_out)      # out (f32)
    transcendentals = M * dim_out + 3 * M

    out = pl.pallas_call(
        _head_kernel,
        out_shape=jax.ShapeDtypeStruct((M, dim_out), x.dtype),
        grid_spec=pltpu.PrefetchScalarGridSpec(
            num_scalar_prefetch=0,
            grid=(grid_m,),
            in_specs=[
                # Last block dim == full array dim (1000), so (8,128) rule holds.
                pl.BlockSpec((tile_m, dim_in), lambda i: (i, 0)),
                # Block-invariant weights: DMA'd once, resident across the grid.
                pl.BlockSpec((dim_in, dim_out), lambda i: (0, 0)),
                pl.BlockSpec((dim_out, dim_out), lambda i: (0, 0)),
                pl.BlockSpec((1, dim_out), lambda i: (0, 0)),
                pl.BlockSpec((1, dim_out), lambda i: (0, 0)),
            ],
            out_specs=pl.BlockSpec((tile_m, dim_out), lambda i: (i, 0)),
        ),
        compiler_params=pltpu.CompilerParams(
            dimension_semantics=("parallel",),      # megacore split on v7x
            vmem_limit_bytes=48 * 1024 * 1024,      # safe on v5e/v6e (128M) & v7x (64M)
        ),
        cost_estimate=pl.CostEstimate(
            flops=flops,
            transcendentals=transcendentals,
            bytes_accessed=bytes_accessed,
        ),
    )(x2d, w1_t, w2_t, gamma2d, beta2d)

    return out.reshape(*lead, dim_out)


def _reference(x, w1, w2, gamma, beta):
    # Pure-JAX f32 reference mirroring the PyTorch module (inference).
    y1 = x @ w1.T
    y2 = _gelu_exact(y1) @ w2.T
    z = y1 + y2
    mean = jnp.mean(z, axis=-1, keepdims=True)
    var = jnp.mean((z - mean) ** 2, axis=-1, keepdims=True)
    emb = (z - mean) * lax.rsqrt(var + LN_EPS) * gamma + beta
    return emb / jnp.linalg.norm(emb, axis=-1, keepdims=True)


if __name__ == "__main__":
    key = jax.random.PRNGKey(0)
    batch, dim_in, dim_out = 2, 1000, 512   # resnet50 logits -> out_dim=512

    k_x, k_w1, k_w2 = jax.random.split(key, 3)
    # TODO(synk): frozen pretrained ResNet50 backbone is not translated; random
    # features stand in for base(images) output of shape [batch, 1000].
    features = jax.random.normal(k_x, (batch, dim_in), dtype=jnp.float32)

    # Deterministic parameter init (Kaiming-uniform-ish scale for the linears).
    w1 = jax.random.uniform(k_w1, (dim_out, dim_in), jnp.float32,
                            minval=-1.0, maxval=1.0) / jnp.sqrt(dim_in)
    w2 = jax.random.uniform(k_w2, (dim_out, dim_out), jnp.float32,
                            minval=-1.0, maxval=1.0) / jnp.sqrt(dim_out)
    gamma = jnp.ones((dim_out,), jnp.float32)    # nn.LayerNorm default weight
    beta = jnp.zeros((dim_out,), jnp.float32)    # nn.LayerNorm default bias

    params = prepare_head_params(w1, w2, gamma, beta)   # one-time prep
    out = image_embedding_head(features, params)
    out = jax.block_until_ready(out)

    ref = _reference(features, w1, w2, gamma, beta)
    assert out.shape == (batch, dim_out)
    # bf16 MXU operands (f32 accumulation + f32 LN/L2) -> loosened tolerance
    # vs the f32 reference.
    assert jnp.allclose(out, ref, atol=5e-3, rtol=5e-2), "mismatch vs reference"

    print("KERNEL_OK")
</pallas_src>

<mosaic_0001>
module attributes {stable_mosaic.version = 11 : i64} {
  func.func @_head_kernel(%arg0: i32, %arg1: memref<8x1000xf32, #tpu.memory_space<vmem>>, %arg2: memref<1000x512xbf16, #tpu.memory_space<vmem>>, %arg3: memref<512x512xbf16, #tpu.memory_space<vmem>>, %arg4: memref<1x512xf32, #tpu.memory_space<vmem>>, %arg5: memref<1x512xf32, #tpu.memory_space<vmem>>, %arg6: memref<8x512xf32, #tpu.memory_space<vmem>>) attributes {dimension_semantics = [#tpu.dimension_semantics<parallel>], iteration_bounds = array<i64: 1>, scalar_prefetch = 0 : i64, scratch_operands = 0 : i64, tpu.core_type = #tpu.core_type<tc>, window_params = [{transform_indices = @transform_0, window_bounds = array<i64: 8, 1000>}, {pipeline_mode = #tpu.pipeline_mode<synchronous>, transform_indices = @transform_1, window_bounds = array<i64: 1000, 512>}, {pipeline_mode = #tpu.pipeline_mode<synchronous>, transform_indices = @transform_2, window_bounds = array<i64: 512, 512>}, {pipeline_mode = #tpu.pipeline_mode<synchronous>, transform_indices = @transform_3, window_bounds = array<i64: 1, 512>}, {pipeline_mode = #tpu.pipeline_mode<synchronous>, transform_indices = @transform_4, window_bounds = array<i64: 1, 512>}, {transform_indices = @transform_5, window_bounds = array<i64: 8, 512>}]} {
    %c0 = arith.constant 0 : index
    %c0_0 = arith.constant 0 : index
    %0 = vector.load %arg1[%c0, %c0_0] : memref<8x1000xf32, #tpu.memory_space<vmem>>, vector<8x1000xf32>
    %1 = arith.truncf %0 : vector<8x1000xf32> to vector<8x1000xbf16>
    %c0_1 = arith.constant 0 : index
    %c0_2 = arith.constant 0 : index
    %2 = vector.load %arg2[%c0_1, %c0_2] : memref<1000x512xbf16, #tpu.memory_space<vmem>>, vector<1000x512xbf16>
    %cst = arith.constant dense<0.000000e+00> : vector<8x512xf32>
    %3 = tpu.matmul %1, %2, %cst {dimension_numbers = #tpu.dot_dimension_numbers<[1], [0], [0], [1], [0, 0, 1, 1], [], []>} : vector<8x1000xbf16>, vector<1000x512xbf16>, vector<8x512xf32> -> vector<8x512xf32>
    %cst_3 = arith.constant 5.000000e-01 : f32
    %4 = vector.broadcast %cst_3 : f32 to vector<8x512xf32>
    %5 = arith.mulf %4, %3 : vector<8x512xf32>
    %cst_4 = arith.constant 0.707106769 : f32
    %6 = vector.broadcast %cst_4 : f32 to vector<8x512xf32>
    %7 = arith.mulf %3, %6 : vector<8x512xf32>
    %8 = math.erf %7 : vector<8x512xf32>
    %cst_5 = arith.constant 1.000000e+00 : f32
    %9 = vector.broadcast %cst_5 : f32 to vector<8x512xf32>
    %10 = arith.addf %9, %8 : vector<8x512xf32>
    %11 = arith.mulf %5, %10 : vector<8x512xf32>
    %12 = arith.truncf %11 : vector<8x512xf32> to vector<8x512xbf16>
    %c0_6 = arith.constant 0 : index
    %c0_7 = arith.constant 0 : index
    %13 = vector.load %arg3[%c0_6, %c0_7] : memref<512x512xbf16, #tpu.memory_space<vmem>>, vector<512x512xbf16>
    %cst_8 = arith.constant dense<0.000000e+00> : vector<8x512xf32>
    %14 = tpu.matmul %12, %13, %cst_8 {dimension_numbers = #tpu.dot_dimension_numbers<[1], [0], [0], [1], [0, 0, 1, 1], [], []>} : vector<8x512xbf16>, vector<512x512xbf16>, vector<8x512xf32> -> vector<8x512xf32>
    %15 = arith.addf %3, %14 : vector<8x512xf32>
    %cst_9 = arith.constant dense<0.000000e+00> : vector<8xf32>
    %16 = vector.multi_reduction <add>, %15, %cst_9 [1] : vector<8x512xf32> to vector<8xf32>
    %17 = vector.shape_cast %16 : vector<8xf32> to vector<8x1xf32>
    %cst_10 = arith.constant 0.001953125 : f32
    %18 = vector.broadcast %cst_10 : f32 to vector<8x1xf32>
    %19 = arith.mulf %17, %18 : vector<8x1xf32>
    %20 = vector.broadcast %19 : vector<8x1xf32> to vector<8x512xf32>
    %21 = arith.subf %15, %20 : vector<8x512xf32>
    %22 = arith.mulf %21, %21 : vector<8x512xf32>
    %cst_11 = arith.constant dense<0.000000e+00> : vector<8xf32>
    %23 = vector.multi_reduction <add>, %22, %cst_11 [1] : vector<8x512xf32> to vector<8xf32>
    %24 = vector.shape_cast %23 : vector<8xf32> to vector<8x1xf32>
    %cst_12 = arith.constant 0.001953125 : f32
    %25 = vector.broadcast %cst_12 : f32 to vector<8x1xf32>
    %26 = arith.mulf %24, %25 : vector<8x1xf32>
    %cst_13 = arith.constant 9.99999974E-6 : f32
    %27 = vector.broadcast %cst_13 : f32 to vector<8x1xf32>
    %28 = arith.addf %26, %27 : vector<8x1xf32>
    %29 = math.rsqrt %28 : vector<8x1xf32>
    %30 = vector.broadcast %29 : vector<8x1xf32> to vector<8x512xf32>
    %31 = arith.mulf %21, %30 : vector<8x512xf32>
    %c0_14 = arith.constant 0 : index
    %c0_15 = arith.constant 0 : index
    %32 = vector.load %arg4[%c0_14, %c0_15] : memref<1x512xf32, #tpu.memory_space<vmem>>, vector<1x512xf32>
    %33 = vector.broadcast %32 : vector<1x512xf32> to vector<8x512xf32>
    %34 = arith.mulf %31, %33 : vector<8x512xf32>
    %c0_16 = arith.constant 0 : index
    %c0_17 = arith.constant 0 : index
    %35 = vector.load %arg5[%c0_16, %c0_17] : memref<1x512xf32, #tpu.memory_space<vmem>>, vector<1x512xf32>
    %36 = vector.broadcast %35 : vector<1x512xf32> to vector<8x512xf32>
    %37 = arith.addf %34, %36 : vector<8x512xf32>
    %38 = arith.mulf %37, %37 : vector<8x512xf32>
    %cst_18 = arith.constant dense<0.000000e+00> : vector<8xf32>
    %39 = vector.multi_reduction <add>, %38, %cst_18 [1] : vector<8x512xf32> to vector<8xf32>
    %40 = vector.shape_cast %39 : vector<8xf32> to vector<8x1xf32>
    %cst_19 = arith.constant 9.99999996E-13 : f32
    %41 = vector.broadcast %cst_19 : f32 to vector<8x1xf32>
    %42 = arith.maximumf %40, %41 : vector<8x1xf32>
    %43 = math.rsqrt %42 : vector<8x1xf32>
    %44 = vector.broadcast %43 : vector<8x1xf32> to vector<8x512xf32>
    %45 = arith.mulf %37, %44 : vector<8x512xf32>
    %c0_20 = arith.constant 0 : index
    %c0_21 = arith.constant 0 : index
    %46 = vector.load %arg6[%c0_20, %c0_21] : memref<8x512xf32, #tpu.memory_space<vmem>>, vector<8x512xf32>
    tpu.vector_store %arg6[%c0_20, %c0_21], %45 {strides = array<i32>} : memref<8x512xf32, #tpu.memory_space<vmem>>, vector<8x512xf32>,
    return
  }
  func.func @transform_0(%arg0: i32) -> (i32, i32) {
    %c0_i32 = arith.constant 0 : i32
    %c0_i32_0 = arith.constant 0 : i32
    return %arg0, %c0_i32 : i32, i32
  }
  func.func @transform_1(%arg0: i32) -> (i32, i32) {
    %c0_i32 = arith.constant 0 : i32
    %c0_i32_0 = arith.constant 0 : i32
    %c0_i32_1 = arith.constant 0 : i32
    return %c0_i32, %c0_i32_0 : i32, i32
  }
  func.func @transform_2(%arg0: i32) -> (i32, i32) {
    %c0_i32 = arith.constant 0 : i32
    %c0_i32_0 = arith.constant 0 : i32
    %c0_i32_1 = arith.constant 0 : i32
    return %c0_i32, %c0_i32_0 : i32, i32
  }
  func.func @transform_3(%arg0: i32) -> (i32, i32) {
    %c0_i32 = arith.constant 0 : i32
    %c0_i32_0 = arith.constant 0 : i32
    %c0_i32_1 = arith.constant 0 : i32
    return %c0_i32, %c0_i32_0 : i32, i32
  }
  func.func @transform_4(%arg0: i32) -> (i32, i32) {
    %c0_i32 = arith.constant 0 : i32
    %c0_i32_0 = arith.constant 0 : i32
    %c0_i32_1 = arith.constant 0 : i32
    return %c0_i32, %c0_i32_0 : i32, i32
  }
  func.func @transform_5(%arg0: i32) -> (i32, i32) {
    %c0_i32 = arith.constant 0 : i32
    %c0_i32_0 = arith.constant 0 : i32
    return %arg0, %c0_i32 : i32, i32
  }
}

</mosaic_0001>

<bundles_post_ra>
// kernel: tpu_custom_call.1
= control target key start
LH: loop header
LB: loop body
LE: loop exit
PB: predicated region body
PF: predicated region fallthrough
CT: control target
= control target key end

     0   :  { %10 = vsyncpa [#allocation3], 0  ;;  %s4408_s0 = inlined_call_operand.hbm [shape: f32[2,1000], index: 0, kind: input, shape index: {}]   ;;  %s4409_s1 = inlined_call_operand.hbm [shape: bf16[1000,512], index: 1, kind: input, shape index: {}]   ;;  %s4410_s2 = inlined_call_operand.hbm [shape: bf16[512,512], index: 2, kind: input, shape index: {}]   ;;  %s4411_s3 = inlined_call_operand.vmem [shape: f32[1,512], index: 3, kind: input, shape index: {}]   ;;  %s4412_s4 = inlined_call_operand.hbm [shape: f32[1,512], index: 4, kind: input, shape index: {}]   ;;  %s4413_s5 = inlined_call_operand.hbm [shape: f32[2,512], index: 5, kind: output, shape index: {}]  }
   0x1   :  { %11 = vsyncpa [#allocation6], 0 }
   0x2   :  { %12 = vsyncpa [#allocation9], 0 }
   0x3   :  { %13 = vsyncpa [#allocation4], 0 }
   0x4   :  { %18 = vsyncadd [#allocation3], 768  ;;  %s4238_s18 = smov [#allocation5]   ;;  %s4239_s20 = smov [#allocation2]  }
   0x5   :  { %s31_s19 = sshll.u32 %s4238_s18, 4  ;;  %s19_s21 = sshll.u32 %s4239_s20, 4  ;;  %s32_s19 = int_to_ptr.vmem [resolvable:$true] %s31_s19  ;;  %s20_s21 = int_to_ptr.vmem [resolvable:$true] %s19_s21 }
   0x6   :  { %s4138_s22 = scalar_lea.vmem %s32_s19, 32000  ;;  %p4143_p1 = scmp.lt.s32.totalorder %s32_s19, %s32_s19 }
   0x7   :  { %p4139_p0 = scmp.ne.s32.totalorder %s32_s19, %s4138_s22  ;;  %p4144_p2 = scmp.lt.s32.totalorder %s4138_s22, %s4138_s22 }
   0x9   :  { %p4145_p3 = por %p4144_p2, %p4143_p1 }
   0xb   :  { %p4146_p4 = pnand %p4145_p3, %p4139_p0 }
   0xd   :  { %4149 = shalt.err (!%p4146_p4)
}
   0xe   :  { %s4240_s23 = smov 256   ;;  %s4241_s24 = smov 16  }
   0xf   :  { %37 = dma.hbm_to_vmem [thread:$0]  %s4409_s1, 32000, %s32_s19, [#allocation6], %s4240_s23, %s4240_s23, %s4241_s24  }
  0x10   :  { %s4158_s27 = scalar_lea.vmem %s20_s21, 256  ;;  %s4162_s28 = scalar_lea.vmem %s20_s21, 1024 }
  0x11   :  { %p4159_p5 = scmp.ne.s32.totalorder %s20_s21, %s4158_s27  ;;  %p4163_p6 = scmp.lt.s32.totalorder %s20_s21, %s20_s21 }
  0x12   :  { %p4164_p7 = scmp.lt.s32.totalorder %s4162_s28, %s4158_s27 }
  0x14   :  { %p4165_p8 = por %p4164_p7, %p4163_p6 }
  0x16   :  { %p4166_p9 = pnand %p4165_p8, %p4159_p5 }
  0x18   :  { %4169 = shalt.err (!%p4166_p9)
}
  0x19   :  { %25 = dma.hbm_to_vmem [thread:$0]  %s4408_s0, 256, %s20_s21, [#allocation3], %s4240_s23, %s4240_s23, %s4241_s24  }
  0x1a   :  { %s4242_s6 = smov [#allocation7]   ;;  %s4243_s8 = smov [#allocation8]  }
  0x1b   :  { %s43_s7 = sshll.u32 %s4242_s6, 4  ;;  %s58_s9 = sshll.u32 %s4243_s8, 4  ;;  %s44_s7 = int_to_ptr.vmem [resolvable:$true] %s43_s7  ;;  %s59_s9 = int_to_ptr.vmem [resolvable:$true] %s58_s9 }
  0x1c   :  { %s4178_s10 = scalar_lea.vmem %s44_s7, 16384  ;;  %p4183_p11 = scmp.lt.s32.totalorder %s44_s7, %s44_s7 }
  0x1d   :  { %p4179_p10 = scmp.ne.s32.totalorder %s44_s7, %s4178_s10  ;;  %p4184_p12 = scmp.lt.s32.totalorder %s4178_s10, %s4178_s10 }
  0x1f   :  { %p4185_p13 = por %p4184_p12, %p4183_p11 }
  0x21   :  { %p4186_p0 = pnand %p4185_p13, %p4179_p10 }
  0x23   :  { %4189 = shalt.err (!%p4186_p0)
}
  0x24   :  { %49 = dma.hbm_to_vmem [thread:$0]  %s4410_s2, 16384, %s44_s7, [#allocation6], %s4240_s23, %s4240_s23, %s4241_s24  }
  0x25   :  { %s4198_s12 = scalar_lea.vmem %s59_s9, 64  ;;  %p4203_p2 = scmp.lt.s32.totalorder %s59_s9, %s59_s9 }
  0x26   :  { %p4199_p1 = scmp.ne.s32.totalorder %s59_s9, %s4198_s12  ;;  %p4204_p3 = scmp.lt.s32.totalorder %s4198_s12, %s4198_s12 }
  0x28   :  { %p4205_p4 = por %p4204_p3, %p4203_p2 }
  0x2a   :  { %p4206_p5 = pnand %p4205_p4, %p4199_p1 }
  0x2c   :  { %4209 = shalt.err (!%p4206_p5)
}
  0x2d   :  { %61 = dma.hbm_to_vmem [thread:$0]  %s4412_s4, 64, %s59_s9, [#allocation9]  }
  0x2e   :  { %4230 = dma.done.wait [#allocation3], 1024  }
  0x2f   :  { %4231 = vsyncadd [#allocation3], 4294966272 }
  0x30   :  { %4232 = dma.done.wait [#allocation6], 48384  }
  0x31   :  { %4233 = vsyncadd [#allocation6], 4294918912 }
  0x32   :  { %4234 = dma.done.wait [#allocation9], 64  }
  0x33   :  { %4235 = vsyncadd [#allocation9], 4294967232  ;;  %v3538_v0 = vld [vmem:[#allocation5 + $0xe4] ss:$16 sps:$4 sm:$0xff]   ;;  %v3542_v2 = vld [vmem:[#allocation5 + $0xe0] ss:$16 sps:$4 sm:$0xff]   ;;  %v98_v40 = vlaneseq }
  0x34   :  { %v3540_v1 = vld [vmem:[#allocation5 + $0x2e4] ss:$16 sps:$4 sm:$0xff]   ;;  %1696 = vmatprep.subr.bf16.mxu0 %v3538_v0  ;;  %v3543_v3 = vld [vmem:[#allocation5 + $0x2e0] ss:$16 sps:$4 sm:$0xff]   ;;  %v4244_v38 = vmov 1983009808  }
  0x35   :  { %1737 = vmatprep.subr.bf16.mxu1 %v3540_v1  ;;  %v3544_v4 = vld [vmem:[#allocation5 + $0xc4] ss:$16 sps:$4 sm:$0xff]   ;;  %1697 = vmatpush1.bf16.msra.mxu0 %v3542_v2  ;;  %v3548_v6 = vld [vmem:[#allocation5 + $0xc0] ss:$16 sps:$4 sm:$0xff]   ;;  %v96_v39 = vunpack.c.l.s4 %v4244_v38  ;;  %v4290_v46 = vshrl.u32 %v98_v40, 7  ;;  %vm1679_vm0 = vcmask 850944  }
  0x36   :  { %1738 = vmatpush1.bf16.msra.mxu1 %v3543_v3  ;;  %v3546_v5 = vld [vmem:[#allocation5 + $0x2c4] ss:$16 sps:$4 sm:$0xff]   ;;  %1698 = vmatprep.subr.bf16.mxu0 %v3544_v4  ;;  %v3549_v7 = vld [vmem:[#allocation5 + $0x2c0] ss:$16 sps:$4 sm:$0xff]   ;;  %vm1683_vm1 = vcmask 1043456  }
  0x37   :  { %1739 = vmatprep.subr.bf16.mxu1 %v3546_v5  ;;  %v3550_v8 = vld [vmem:[#allocation5 + $0xa4] ss:$16 sps:$4 sm:$0xff]   ;;  %v3554_v10 = vld [vmem:[#allocation5 + $0xa0] ss:$16 sps:$4 sm:$0xff]   ;;  %v97_v45 = vunpack.c.0.s8 %v96_v39 }
  0x38   :  { %v3552_v9 = vld [vmem:[#allocation5 + $0x2a4] ss:$16 sps:$4 sm:$0xff]   ;;  %v3555_v11 = vld [vmem:[#allocation5 + $0x2a0] ss:$16 sps:$4 sm:$0xff]  }
  0x39   :  { %1699 = vmatpush1.bf16.msra.mxu0 %v3548_v6  ;;  %v3556_v12 = vld [vmem:[#allocation5 + $0x84] ss:$16 sps:$4 sm:$0xff]   ;;  %v3560_v14 = vld [vmem:[#allocation5 + $0x80] ss:$16 sps:$4 sm:$0xff]   ;;  %v4293_v53 = vsub.s32 %v97_v45, %v4290_v46 }
  0x3a   :  { %1740 = vmatpush1.bf16.msra.mxu1 %v3549_v7  ;;  %1700 = vmatprep.subr.bf16.mxu0 %v3550_v8  ;;  %v3558_v13 = vld [vmem:[#allocation5 + $0x284] ss:$16 sps:$4 sm:$0xff]   ;;  %v3561_v15 = vld [vmem:[#allocation5 + $0x280] ss:$16 sps:$4 sm:$0xff]  }
  0x3b   :  { %1741 = vmatprep.subr.bf16.mxu1 %v3552_v9  ;;  %v3562_v16 = vld [vmem:[#allocation5 + $0x64] ss:$16 sps:$4 sm:$0xff]   ;;  %v3566_v18 = vld [vmem:[#allocation5 + $0x60] ss:$16 sps:$4 sm:$0xff]  }
  0x3c   :  { %v3564_v17 = vld [vmem:[#allocation5 + $0x264] ss:$16 sps:$4 sm:$0xff]   ;;  %v3567_v19 = vld [vmem:[#allocation5 + $0x260] ss:$16 sps:$4 sm:$0xff]  }
  0x3d   :  { %1701 = vmatpush1.bf16.msra.mxu0 %v3554_v10  ;;  %v3568_v20 = vld [vmem:[#allocation5 + $0x44] ss:$16 sps:$4 sm:$0xff]   ;;  %v3572_v22 = vld [vmem:[#allocation5 + $0x40] ss:$16 sps:$4 sm:$0xff]  }
  0x3e   :  { %1742 = vmatpush1.bf16.msra.mxu1 %v3555_v11  ;;  %1702 = vmatprep.subr.bf16.mxu0 %v3556_v12  ;;  %v3570_v21 = vld [vmem:[#allocation5 + $0x244] ss:$16 sps:$4 sm:$0xff]   ;;  %v3573_v23 = vld [vmem:[#allocation5 + $0x240] ss:$16 sps:$4 sm:$0xff]  }
  0x3f   :  { %1743 = vmatprep.subr.bf16.mxu1 %v3558_v13  ;;  %v3574_v24 = vld [vmem:[#allocation5 + $0x24] ss:$16 sps:$4 sm:$0xff]   ;;  %v3578_v26 = vld [vmem:[#allocation5 + $0x20] ss:$16 sps:$4 sm:$0xff]  }
  0x40   :  { %v3576_v25 = vld [vmem:[#allocation5 + $0x224] ss:$16 sps:$4 sm:$0xff]   ;;  %v3579_v27 = vld [vmem:[#allocation5 + $0x220] ss:$16 sps:$4 sm:$0xff]  }
  0x41   :  { %1703 = vmatpush1.bf16.msra.mxu0 %v3560_v14  ;;  %v3580_v28 = vld [vmem:[#allocation5 + $0x4] ss:$16 sps:$4 sm:$0xff]   ;;  %v3584_v30 = vld [vmem:[#allocation5] ss:$16 sps:$4 sm:$0xff]  }
  0x42   :  { %1744 = vmatpush1.bf16.msra.mxu1 %v3561_v15  ;;  %1704 = vmatprep.subr.bf16.mxu0 %v3562_v16  ;;  %v3582_v29 = vld [vmem:[#allocation5 + $0x204] ss:$16 sps:$4 sm:$0xff]   ;;  %v3585_v31 = vld [vmem:[#allocation5 + $0x200] ss:$16 sps:$4 sm:$0xff]  }
  0x43   :  { %1745 = vmatprep.subr.bf16.mxu1 %v3564_v17  ;;  %v3586_v32 = vld [vmem:[#allocation5 + $0x1e4] ss:$16 sps:$4 sm:$0xff]   ;;  %v3590_v34 = vld [vmem:[#allocation5 + $0x1e0] ss:$16 sps:$4 sm:$0xff]  }
  0x44   :  { %v3588_v33 = vld [vmem:[#allocation5 + $0x3e4] ss:$16 sps:$4 sm:$0xff]   ;;  %v3591_v35 = vld [vmem:[#allocation5 + $0x3e0] ss:$16 sps:$4 sm:$0xff]  }
  0x45   :  { %1705 = vmatpush1.bf16.msra.mxu0 %v3566_v18  ;;  %v3592_v36 = vld [vmem:[#allocation5 + $0x1c4] ss:$16 sps:$4 sm:$0xff]   ;;  %v3596_v41 = vld [vmem:[#allocation5 + $0x1c0] ss:$16 sps:$4 sm:$0xff]  }
  0x46   :  { %1746 = vmatpush1.bf16.msra.mxu1 %v3567_v19  ;;  %1706 = vmatprep.subr.bf16.mxu0 %v3568_v20  ;;  %v3594_v37 = vld [vmem:[#allocation5 + $0x3c4] ss:$16 sps:$4 sm:$0xff]   ;;  %v3597_v42 = vld [vmem:[#allocation5 + $0x3c0] ss:$16 sps:$4 sm:$0xff]  }
  0x47   :  { %1747 = vmatprep.subr.bf16.mxu1 %v3570_v21  ;;  %v3598_v43 = vld [vmem:[#allocation5 + $0x1a4] ss:$16 sps:$4 sm:$0xff]   ;;  %v3602_v47 = vld [vmem:[#allocation5 + $0x1a0] ss:$16 sps:$4 sm:$0xff]  }
  0x48   :  { %v3600_v44 = vld [vmem:[#allocation5 + $0x3a4] ss:$16 sps:$4 sm:$0xff]   ;;  %v3603_v48 = vld [vmem:[#allocation5 + $0x3a0] ss:$16 sps:$4 sm:$0xff]  }
  0x49   :  { %1707 = vmatpush1.bf16.msra.mxu0 %v3572_v22  ;;  %v3604_v49 = vld [vmem:[#allocation5 + $0x184] ss:$16 sps:$4 sm:$0xff]   ;;  %v3608_v51 = vld [vmem:[#allocation5 + $0x180] ss:$16 sps:$4 sm:$0xff]  }
  0x4a   :  { %1748 = vmatpush1.bf16.msra.mxu1 %v3573_v23  ;;  %1708 = vmatprep.subr.bf16.mxu0 %v3574_v24  ;;  %v3606_v50 = vld [vmem:[#allocation5 + $0x384] ss:$16 sps:$4 sm:$0xff]   ;;  %v3609_v52 = vld [vmem:[#allocation5 + $0x380] ss:$16 sps:$4 sm:$0xff]  }
  0x4b   :  { %1749 = vmatprep.subr.bf16.mxu1 %v3576_v25  ;;  %v3610_v54 = vld [vmem:[#allocation5 + $0x164] ss:$16 sps:$4 sm:$0xff]   ;;  %v3634_v56 = vld [vmem:[#allocation2] ss:$16 sps:$4 sm:$0xff]  }
  0x4c   :  { %v3612_v55 = vld [vmem:[#allocation5 + $0x364] ss:$16 sps:$4 sm:$0xff]   ;;  %v3636_v57 = vld [vmem:[#allocation2 + $0x20] ss:$16 sps:$4 sm:$0xff]   ;;  %v101_v60 = vrot.slane %v3634_v56, %v4293_v53 }
  0x4d   :  { %1709 = vmatpush1.bf16.msra.mxu0 %v3578_v26  ;;  %v3638_v58 = vld [vmem:[#allocation2 + $0x4] ss:$16 sps:$4 sm:$0xff]   ;;  %v115_v61 = vrot.slane %v3636_v57, %v4293_v53  ;;  %v3614_v63 = vld [vmem:[#allocation5 + $0x160] ss:$16 sps:$4 sm:$0xff]  }
  0x4e   :  { %1750 = vmatpush1.bf16.msra.mxu1 %v3579_v27  ;;  %1710 = vmatprep.subr.bf16.mxu0 %v3580_v28  ;;  %v3639_v59 = vld [vmem:[#allocation2 + $0x24] ss:$16 sps:$4 sm:$0xff]   ;;  %v108_v62 = vrot.slane %v3638_v58, %v4293_v53  ;;  %v3615_v0 = vld [vmem:[#allocation5 + $0x360] ss:$16 sps:$4 sm:$0xff]   ;;  %v3739_v58 = vld [vmem:[#allocation2 + $0x8] ss:$16 sps:$4 sm:$0xff]  }
  0x4f   :  { %1751 = vmatprep.subr.bf16.mxu1 %v3582_v29  ;;  %v122_v1 = vrot.slane %v3639_v59, %v4293_v53  ;;  %v3616_v2 = vld [vmem:[#allocation5 + $0x144] ss:$16 sps:$4 sm:$0xff]   ;;  %v124_v3 = vcombine.high %v101_v60, %v115_v61  ;;  %v3620_v7 = vld [vmem:[#allocation5 + $0x140] ss:$16 sps:$4 sm:$0xff]   ;;  %v123_v18 = vcombine.low %v101_v60, %v115_v61  ;;  %v3740_v59 = vld [vmem:[#allocation2 + $0x28] ss:$16 sps:$4 sm:$0xff]  }
  0x50   :  { %v3618_v4 = vld [vmem:[#allocation5 + $0x344] ss:$16 sps:$4 sm:$0xff]   ;;  %v3621_v8 = vld [vmem:[#allocation5 + $0x340] ss:$16 sps:$4 sm:$0xff]  }
  0x51   :  { %1711 = vmatpush1.bf16.msra.mxu0 %v3584_v30  ;;  %v126_v5 = vcombine.high %v108_v62, %v122_v1  ;;  %v4299_v6 = vpack.c.bf16 %v124_v3, %v124_v3  ;;  %v3622_v10 = vld [vmem:[#allocation5 + $0x124] ss:$16 sps:$4 sm:$0xff]   ;;  %v3626_v12 = vld [vmem:[#allocation5 + $0x120] ss:$16 sps:$4 sm:$0xff]   ;;  %v125_v19 = vcombine.low %v108_v62, %v122_v1  ;;  %v4305_v22 = vpack.c.bf16 %v123_v18, %v123_v18 }
  0x52   :  { %1752 = vmatpush1.bf16.msra.mxu1 %v3585_v31  ;;  %1712 = vmatprep.subr.bf16.mxu0 %v3586_v32  ;;  %v3624_v11 = vld [vmem:[#allocation5 + $0x324] ss:$16 sps:$4 sm:$0xff]   ;;  %v3627_v13 = vld [vmem:[#allocation5 + $0x320] ss:$16 sps:$4 sm:$0xff]  }
  0x53   :  { %1753 = vmatprep.subr.bf16.mxu1 %v3588_v33  ;;  %v4301_v9 = vpack.c.bf16 %v126_v5, %v126_v5  ;;  %1728 = vmatprep.mubr.bf16.mxu0 %v4299_v6  ;;  %v3628_v14 = vld [vmem:[#allocation5 + $0x104] ss:$16 sps:$4 sm:$0xff]   ;;  %v3632_v16 = vld [vmem:[#allocation5 + $0x100] ss:$16 sps:$4 sm:$0xff]   ;;  %v4307_v23 = vpack.c.bf16 %v125_v19, %v125_v19 }
  0x54   :  { %v3630_v15 = vld [vmem:[#allocation5 + $0x304] ss:$16 sps:$4 sm:$0xff]   ;;  %v3633_v17 = vld [vmem:[#allocation5 + $0x300] ss:$16 sps:$4 sm:$0xff]  }
  0x55   :  { %1713 = vmatpush2.bf16.msra.mxu0 %v3590_v34  ;;  %1769 = vmatprep.mubr.bf16.mxu1 %v4301_v9  ;;  %v3642_v20 = vld [vmem:[#allocation5 + $0x4e4] ss:$16 sps:$4 sm:$0xff]   ;;  %v3640_v24 = vld [vmem:[#allocation5 + $0x4e0] ss:$16 sps:$4 sm:$0xff]  }
  0x56   :  { %1754 = vmatpush2.bf16.msra.mxu1 %v3591_v35  ;;  %1714 = vmatprep.subr.bf16.mxu0 %v3592_v36  ;;  %v3645_v21 = vld [vmem:[#allocation5 + $0x6e4] ss:$16 sps:$4 sm:$0xff]   ;;  %v3643_v25 = vld [vmem:[#allocation5 + $0x6e0] ss:$16 sps:$4 sm:$0xff]  }
  0x57   :  { %1755 = vmatprep.subr.bf16.mxu1 %v3594_v37  ;;  %v3648_v26 = vld [vmem:[#allocation5 + $0x4c4] ss:$16 sps:$4 sm:$0xff]   ;;  %v3646_v28 = vld [vmem:[#allocation5 + $0x4c0] ss:$16 sps:$4 sm:$0xff]  }
  0x58   :  { %v3651_v27 = vld [vmem:[#allocation5 + $0x6c4] ss:$16 sps:$4 sm:$0xff]   ;;  %v3649_v29 = vld [vmem:[#allocation5 + $0x6c0] ss:$16 sps:$4 sm:$0xff]  }
  0x59   :  { %1715 = vmatpush2.bf16.msra.mxu0 %v3596_v41  ;;  %v3654_v30 = vld [vmem:[#allocation5 + $0x4a4] ss:$16 sps:$4 sm:$0xff]   ;;  %v3652_v32 = vld [vmem:[#allocation5 + $0x4a0] ss:$16 sps:$4 sm:$0xff]  }
  0x5a   :  { %1756 = vmatpush2.bf16.msra.mxu1 %v3597_v42  ;;  %1716 = vmatprep.subr.bf16.mxu0 %v3598_v43  ;;  %v3657_v31 = vld [vmem:[#allocation5 + $0x6a4] ss:$16 sps:$4 sm:$0xff]   ;;  %v3655_v33 = vld [vmem:[#allocation5 + $0x6a0] ss:$16 sps:$4 sm:$0xff]  }
  0x5b   :  { %1757 = vmatprep.subr.bf16.mxu1 %v3600_v44  ;;  %v3660_v34 = vld [vmem:[#allocation5 + $0x484] ss:$16 sps:$4 sm:$0xff]   ;;  %v3658_v36 = vld [vmem:[#allocation5 + $0x480] ss:$16 sps:$4 sm:$0xff]  }
  0x5c   :  { %v3663_v35 = vld [vmem:[#allocation5 + $0x684] ss:$16 sps:$4 sm:$0xff]   ;;  %v3661_v37 = vld [vmem:[#allocation5 + $0x680] ss:$16 sps:$4 sm:$0xff]  }
  0x5d   :  { %1717 = vmatpush2.bf16.msra.mxu0 %v3602_v47  ;;  %v3666_v38 = vld [vmem:[#allocation5 + $0x464] ss:$16 sps:$4 sm:$0xff]   ;;  %v3664_v40 = vld [vmem:[#allocation5 + $0x460] ss:$16 sps:$4 sm:$0xff]  }
  0x5e   :  { %1758 = vmatpush2.bf16.msra.mxu1 %v3603_v48  ;;  %1718 = vmatprep.subr.bf16.mxu0 %v3604_v49  ;;  %v3669_v39 = vld [vmem:[#allocation5 + $0x664] ss:$16 sps:$4 sm:$0xff]   ;;  %v3667_v41 = vld [vmem:[#allocation5 + $0x660] ss:$16 sps:$4 sm:$0xff]   ;;  %v3729_v49 = vld [vmem:[#allocation2 + $0xc] ss:$16 sps:$4 sm:$0xff]  }
  0x5f   :  { %1759 = vmatprep.subr.bf16.mxu1 %v3606_v50  ;;  %v3672_v42 = vld [vmem:[#allocation5 + $0x444] ss:$16 sps:$4 sm:$0xff]   ;;  %v3670_v44 = vld [vmem:[#allocation5 + $0x440] ss:$16 sps:$4 sm:$0xff]   ;;  %v3731_v50 = vld [vmem:[#allocation2 + $0x2c] ss:$16 sps:$4 sm:$0xff]  }
  0x60   :  { %v3675_v43 = vld [vmem:[#allocation5 + $0x644] ss:$16 sps:$4 sm:$0xff]   ;;  %v3673_v45 = vld [vmem:[#allocation5 + $0x640] ss:$16 sps:$4 sm:$0xff]   ;;  %v4315_v57 = vrot.slane %v3731_v50, %v4293_v53  ;;  %v3744_v50 = vld [vmem:[#allocation5 + $0x2e8] ss:$16 sps:$4 sm:$0xff]  }
  0x61   :  { %1719 = vmatpush2.bf16.msra.mxu0 %v3608_v51  ;;  %v3678_v47 = vld [vmem:[#allocation5 + $0x424] ss:$16 sps:$4 sm:$0xff]   ;;  %v3676_v51 = vld [vmem:[#allocation5 + $0x420] ss:$16 sps:$4 sm:$0xff]  }
  0x62   :  { %1760 = vmatpush2.bf16.msra.mxu1 %v3609_v52  ;;  %1720 = vmatprep.subr.bf16.mxu0 %v3610_v54  ;;  %v3681_v48 = vld [vmem:[#allocation5 + $0x624] ss:$16 sps:$4 sm:$0xff]   ;;  %v3679_v52 = vld [vmem:[#allocation5 + $0x620] ss:$16 sps:$4 sm:$0xff]   ;;  %v4312_v54 = vrot.slane %v3729_v49, %v4293_v53  ;;  %v3741_v49 = vld [vmem:[#allocation5 + $0xc8] ss:$16 sps:$4 sm:$0xff]  }
  0x63   :  { %1761 = vmatprep.subr.bf16.mxu1 %v3612_v55  ;;  %v3684_v55 = vld [vmem:[#allocation5 + $0x404] ss:$16 sps:$4 sm:$0xff]   ;;  %v3682_v62 = vld [vmem:[#allocation5 + $0x400] ss:$16 sps:$4 sm:$0xff]  }
  0x64   :  { %v3687_v56 = vld [vmem:[#allocation5 + $0x604] ss:$16 sps:$4 sm:$0xff]   ;;  %v162_v61 = vcombine.high %v4312_v54, %v4315_v57  ;;  %v3685_v1 = vld [vmem:[#allocation5 + $0x600] ss:$16 sps:$4 sm:$0xff]  }
  0x65   :  { %1721 = vmatpush2.bf16.msra.mxu0 %v3614_v63  ;;  %v427_v60 = vld [vmem:[#allocation5 + $0x7c0] sm:$0xff]  ;;  %v4320_v63 = vrot.slane %v3739_v58, %v4293_v53  ;;  %v3753_v58 = vld [vmem:[#allocation5 + $0x88] ss:$16 sps:$4 sm:$0xff]  }
  0x66   :  { %1762 = vmatpush2.bf16.msra.mxu1 %v3615_v0  ;;  %1722 = vmatprep.subr.bf16.mxu0 %v3616_v2  ;;  %v4323_v0 = vrot.slane %v3740_v59, %v4293_v53  ;;  %v4325_v2 = vpack.c.bf16 %v162_v61, %v162_v61  ;;  %v3690_v3 = vld [vmem:[#allocation5 + $0x5e4] ss:$16 sps:$4 sm:$0xff]   ;;  %v3392_v5 = vcombine.low %v427_v60, %v427_v60  ;;  %v3699_v18 = vld [vmem:[#allocation5 + $0x5a0] ss:$16 sps:$4 sm:$0xff]   ;;  %v3756_v59 = vld [vmem:[#allocation5 + $0x2a8] ss:$16 sps:$4 sm:$0xff]  }
  0x67   :  { %1763 = vmatprep.subr.bf16.mxu1 %v3618_v4  ;;  %v3393_v4 = vcombine.high %v427_v60, %v427_v60  ;;  %v3702_v19 = vld [vmem:[#allocation5 + $0x780] ss:$16 sps:$4 sm:$0xff]   ;;  %v3761_v60 = vld [vmem:[#allocation5 + $0x6c] ss:$16 sps:$4 sm:$0xff]   ;;  %v3759_v61 = vld [vmem:[#allocation5 + $0x68] ss:$16 sps:$4 sm:$0xff]  }
  0x69   :  { %1723 = vmatpush2.bf16.msra.mxu0 %v3620_v7  ;;  %v160_v7 = vcombine.high %v4320_v63, %v4323_v0 }
  0x6a   :  { %1764 = vmatpush2.bf16.msra.mxu1 %v3621_v8  ;;  %1724 = vmatprep.subr.bf16.mxu0 %v3622_v10  ;;  %v3688_v10 = vld [vmem:[#allocation5 + $0x5e0] ss:$16 sps:$4 sm:$0xff]  }
  0x6b   :  { %1765 = vmatprep.subr.bf16.mxu1 %v3624_v11  ;;  %v4331_v8 = vpack.c.bf16 %v160_v7, %v160_v7  ;;  %v1685_v11 = vsel %vm1683_vm1, %v3392_v5, 0  ;;  %v3771_v5 = vld [vmem:[#allocation5 + $0x28] ss:$16 sps:$4 sm:$0xff]  }
  0x6c   :  { %v3774_v7 = vld [vmem:[#allocation5 + $0x248] ss:$16 sps:$4 sm:$0xff]  }
  0x6d   :  { %1725 = vmatpush2.bf16.msra.mxu0 %v3626_v12  ;;  %v3695_v12 = vld [vmem:[#allocation5 + $0x5c4] ss:$16 sps:$4 sm:$0xff]  }
  0x6e   :  { %1766 = vmatpush2.bf16.msra.mxu1 %v3627_v13  ;;  %1726 = vmatprep.subr.bf16.mxu0 %v3628_v14  ;;  %v3698_v13 = vld [vmem:[#allocation5 + $0x7a4] ss:$16 sps:$4 sm:$0xff]   ;;  %v3693_v14 = vld [vmem:[#allocation5 + $0x5c0] ss:$16 sps:$4 sm:$0xff]  }
  0x6f   :  { %1767 = vmatprep.subr.bf16.mxu1 %v3630_v15  ;;  %v3696_v15 = vld [vmem:[#allocation5 + $0x7a0] ss:$16 sps:$4 sm:$0xff]  }
  0x71   :  { %1727 = vmatpush2.bf16.msra.mxu0 %v3632_v16  ;;  %v3701_v16 = vld [vmem:[#allocation5 + $0x5a4] ss:$16 sps:$4 sm:$0xff]  }
  0x72   :  { %1768 = vmatpush2.bf16.msra.mxu1 %v3633_v17  ;;  %1778 = vmatprep.subr.bf16.mxu0 %v3642_v20  ;;  %v3704_v17 = vld [vmem:[#allocation5 + $0x784] ss:$16 sps:$4 sm:$0xff]  }
  0x73   :  { %1819 = vmatprep.subr.bf16.mxu1 %v3645_v21  ;;  %v3707_v20 = vld [vmem:[#allocation5 + $0x584] ss:$16 sps:$4 sm:$0xff]  }
  0x74   :  { %1729 = vmatmul.mubr.bf16.vlgmr.msra.gmra.mxu0 %v4305_v22  ;;  %v3710_v21 = vld [vmem:[#allocation5 + $0x764] ss:$16 sps:$4 sm:$0xff]  }
  0x75   :  { %1770 = vmatmul.mubr.bf16.vlgmr.msra.gmra.mxu1 %v4307_v23  ;;  %1779 = vmatpush1.bf16.msra.mxu0 %v3640_v24  ;;  %v3705_v24 = vld [vmem:[#allocation5 + $0x580] ss:$16 sps:$4 sm:$0xff]  }
  0x76   :  { %1820 = vmatpush1.bf16.msra.mxu1 %v3643_v25  ;;  %1780 = vmatprep.subr.bf16.mxu0 %v3648_v26  ;;  %v3708_v25 = vld [vmem:[#allocation5 + $0x760] ss:$16 sps:$4 sm:$0xff]   ;;  %v3713_v26 = vld [vmem:[#allocation5 + $0x564] ss:$16 sps:$4 sm:$0xff]  }
  0x77   :  { %1821 = vmatprep.subr.bf16.mxu1 %v3651_v27  ;;  %3397 = vmatprep.mubr.msk.bf16.mxu1 %vm1679_vm0, %v4325_v2  ;;  %v3716_v27 = vld [vmem:[#allocation5 + $0x744] ss:$16 sps:$4 sm:$0xff]  }
  0x78   :  { %1810 = vmatprep.mubr.bf16.mxu0 %v4331_v8 }
  0x79   :  { %1781 = vmatpush1.bf16.msra.mxu0 %v3646_v28  ;;  %v3711_v28 = vld [vmem:[#allocation5 + $0x560] ss:$16 sps:$4 sm:$0xff]  }
  0x7a   :  { %1822 = vmatpush1.bf16.msra.mxu1 %v3649_v29  ;;  %1782 = vmatprep.subr.bf16.mxu0 %v3654_v30  ;;  %v3714_v29 = vld [vmem:[#allocation5 + $0x740] ss:$16 sps:$4 sm:$0xff]   ;;  %v3719_v30 = vld [vmem:[#allocation5 + $0x544] ss:$16 sps:$4 sm:$0xff]  }
  0x7b   :  { %1823 = vmatprep.subr.bf16.mxu1 %v3657_v31  ;;  %v3722_v31 = vld [vmem:[#allocation5 + $0x724] ss:$16 sps:$4 sm:$0xff]  }
  0x7d   :  { %1783 = vmatpush1.bf16.msra.mxu0 %v3652_v32  ;;  %v3717_v32 = vld [vmem:[#allocation5 + $0x540] ss:$16 sps:$4 sm:$0xff]  }
  0x7e   :  { %1824 = vmatpush1.bf16.msra.mxu1 %v3655_v33  ;;  %1784 = vmatprep.subr.bf16.mxu0 %v3660_v34  ;;  %v3720_v33 = vld [vmem:[#allocation5 + $0x720] ss:$16 sps:$4 sm:$0xff]   ;;  %v3725_v34 = vld [vmem:[#allocation5 + $0x524] ss:$16 sps:$4 sm:$0xff]  }
  0x7f   :  { %1825 = vmatprep.subr.bf16.mxu1 %v3663_v35  ;;  %v3728_v35 = vld [vmem:[#allocation5 + $0x704] ss:$16 sps:$4 sm:$0xff]  }
  0x81   :  { %1785 = vmatpush1.bf16.msra.mxu0 %v3658_v36  ;;  %v3723_v36 = vld [vmem:[#allocation5 + $0x520] ss:$16 sps:$4 sm:$0xff]  }
  0x82   :  { %1826 = vmatpush1.bf16.msra.mxu1 %v3661_v37  ;;  %1786 = vmatprep.subr.bf16.mxu0 %v3666_v38  ;;  %v161_v37 = vcombine.low %v4312_v54, %v4315_v57  ;;  %v3726_v38 = vld [vmem:[#allocation5 + $0x700] ss:$16 sps:$4 sm:$0xff]   ;;  %v3747_v54 = vld [vmem:[#allocation5 + $0xa8] ss:$16 sps:$4 sm:$0xff]   ;;  %v3758_v57 = vld [vmem:[#allocation5 + $0x2ac] ss:$16 sps:$4 sm:$0xff]  }
  0x83   :  { %1827 = vmatprep.subr.bf16.mxu1 %v3669_v39  ;;  %v3735_v39 = vld [vmem:[#allocation5 + $0x504] ss:$16 sps:$4 sm:$0xff]  }
  0x85   :  { %1787 = vmatpush1.bf16.msra.mxu0 %v3664_v40  ;;  %v3738_v40 = vld [vmem:[#allocation5 + $0xec] ss:$16 sps:$4 sm:$0xff]  }
  0x86   :  { %1828 = vmatpush1.bf16.msra.mxu1 %v3667_v41  ;;  %1788 = vmatprep.subr.bf16.mxu0 %v3672_v42  ;;  %v3733_v41 = vld [vmem:[#allocation5 + $0x500] ss:$16 sps:$4 sm:$0xff]   ;;  %v4338_v42 = vpack.c.bf16 %v161_v37, %v161_v37  ;;  %v3818_v37 = vld [vmem:[#allocation5 + $0x36c] ss:$16 sps:$4 sm:$0xff]  }
  0x87   :  { %1829 = vmatprep.subr.bf16.mxu1 %v3675_v43  ;;  %v159_v43 = vcombine.low %v4320_v63, %v4323_v0  ;;  %v3767_v63 = vld [vmem:[#allocation5 + $0x4c] ss:$16 sps:$4 sm:$0xff]  }
  0x88   :  { %v3770_v0 = vld [vmem:[#allocation5 + $0x26c] ss:$16 sps:$4 sm:$0xff]  }
  0x89   :  { %1789 = vmatpush1.bf16.msra.mxu0 %v3670_v44  ;;  %v3736_v44 = vld [vmem:[#allocation5 + $0xe8] ss:$16 sps:$4 sm:$0xff]  }
  0x8a   :  { %1830 = vmatpush1.bf16.msra.mxu1 %v3673_v45  ;;  %1790 = vmatprep.subr.bf16.mxu0 %v3678_v47  ;;  %v3743_v45 = vld [vmem:[#allocation5 + $0xcc] ss:$16 sps:$4 sm:$0xff]  }
  0x8b   :  { %1831 = vmatprep.subr.bf16.mxu1 %v3681_v48  ;;  %v3746_v47 = vld [vmem:[#allocation5 + $0x2ec] ss:$16 sps:$4 sm:$0xff]   ;;  %v4343_v48 = vpack.c.bf16 %v159_v43, %v159_v43  ;;  %v3819_v43 = vld [vmem:[#allocation5 + $0x128] ss:$16 sps:$4 sm:$0xff]  }
  0x8d   :  { %1791 = vmatpush1.bf16.msra.mxu0 %v3676_v51  ;;  %v3749_v51 = vld [vmem:[#allocation5 + $0xac] ss:$16 sps:$4 sm:$0xff]  }
  0x8e   :  { %1832 = vmatpush1.bf16.msra.mxu1 %v3679_v52  ;;  %1792 = vmatprep.subr.bf16.mxu0 %v3684_v55  ;;  %v3752_v52 = vld [vmem:[#allocation5 + $0x2cc] ss:$16 sps:$4 sm:$0xff]   ;;  %v3750_v55 = vld [vmem:[#allocation5 + $0x2c8] ss:$16 sps:$4 sm:$0xff]  }
  0x8f   :  { %1833 = vmatprep.subr.bf16.mxu1 %v3687_v56  ;;  %v3755_v56 = vld [vmem:[#allocation5 + $0x8c] ss:$16 sps:$4 sm:$0xff]  }
  0x91   :  { %1793 = vmatpush1.bf16.msra.mxu0 %v3682_v62  ;;  %v3762_v62 = vld [vmem:[#allocation5 + $0x288] ss:$16 sps:$4 sm:$0xff]  }
  0x92   :  { %1834 = vmatpush1.bf16.msra.mxu1 %v3685_v1  ;;  %1794 = vmatprep.subr.bf16.mxu0 %v3690_v3  ;;  %v3765_v1 = vld [vmem:[#allocation5 + $0x48] ss:$16 sps:$4 sm:$0xff]   ;;  %v3773_v3 = vld [vmem:[#allocation5 + $0x2c] ss:$16 sps:$4 sm:$0xff]  }
  0x93   :  { %3396 = vmatprep.subr.msk.bf16.mxu1 %vm1683_vm1, %v3393_v4  ;;  %v3776_v4 = vld [vmem:[#allocation5 + $0x24c] ss:$16 sps:$4 sm:$0xff]  }
  0x95   :  { %1795 = vmatpush2.bf16.msra.mxu0 %v3688_v10  ;;  %v3779_v10 = vld [vmem:[#allocation5 + $0xc] ss:$16 sps:$4 sm:$0xff]  }
  0x96   :  { %1838 = vmatpush2.bf16.msra.mxu1 %v1685_v11  ;;  %1796 = vmatprep.subr.bf16.mxu0 %v3695_v12  ;;  %v3782_v11 = vld [vmem:[#allocation5 + $0x22c] ss:$16 sps:$4 sm:$0xff]   ;;  %v3777_v12 = vld [vmem:[#allocation5 + $0x8] ss:$16 sps:$4 sm:$0xff]  }
  0x97   :  { %1839 = vmatprep.subr.bf16.mxu1 %v3698_v13  ;;  %v3780_v13 = vld [vmem:[#allocation5 + $0x228] ss:$16 sps:$4 sm:$0xff]  }
  0x99   :  { %1797 = vmatpush2.bf16.msra.mxu0 %v3693_v14  ;;  %v3785_v14 = vld [vmem:[#allocation5 + $0x1ec] ss:$16 sps:$4 sm:$0xff]  }
  0x9a   :  { %1840 = vmatpush2.bf16.msra.mxu1 %v3696_v15  ;;  %1798 = vmatprep.subr.bf16.mxu0 %v3701_v16  ;;  %v3788_v15 = vld [vmem:[#allocation5 + $0x20c] ss:$16 sps:$4 sm:$0xff]   ;;  %v3783_v16 = vld [vmem:[#allocation5 + $0x1e8] ss:$16 sps:$4 sm:$0xff]  }
  0x9b   :  { %1841 = vmatprep.subr.bf16.mxu1 %v3704_v17  ;;  %v3786_v17 = vld [vmem:[#allocation5 + $0x208] ss:$16 sps:$4 sm:$0xff]  }
  0x9d   :  { %1799 = vmatpush2.bf16.msra.mxu0 %v3699_v18  ;;  %v3791_v18 = vld [vmem:[#allocation5 + $0x1cc] ss:$16 sps:$4 sm:$0xff]  }
  0x9e   :  { %1842 = vmatpush2.bf16.msra.mxu1 %v3702_v19  ;;  %1800 = vmatprep.subr.bf16.mxu0 %v3707_v20  ;;  %v3794_v19 = vld [vmem:[#allocation5 + $0x3ec] ss:$16 sps:$4 sm:$0xff]   ;;  %v3789_v20 = vld [vmem:[#allocation5 + $0x1c8] ss:$16 sps:$4 sm:$0xff]  }
  0x9f   :  { %1843 = vmatprep.subr.bf16.mxu1 %v3710_v21  ;;  %v3792_v21 = vld [vmem:[#allocation5 + $0x3e8] ss:$16 sps:$4 sm:$0xff]  }
  0xa1   :  { %1801 = vmatpush2.bf16.msra.mxu0 %v3705_v24  ;;  %v3797_v24 = vld [vmem:[#allocation5 + $0x1ac] ss:$16 sps:$4 sm:$0xff]  }
  0xa2   :  { %1844 = vmatpush2.bf16.msra.mxu1 %v3708_v25  ;;  %1802 = vmatprep.subr.bf16.mxu0 %v3713_v26  ;;  %v3800_v25 = vld [vmem:[#allocation5 + $0x3cc] ss:$16 sps:$4 sm:$0xff]   ;;  %v3795_v26 = vld [vmem:[#allocation5 + $0x1a8] ss:$16 sps:$4 sm:$0xff]  }
  0xa3   :  { %1845 = vmatprep.subr.bf16.mxu1 %v3716_v27  ;;  %v3798_v27 = vld [vmem:[#allocation5 + $0x3c8] ss:$16 sps:$4 sm:$0xff]  }
  0xa5   :  { %1803 = vmatpush2.bf16.msra.mxu0 %v3711_v28  ;;  %v3803_v28 = vld [vmem:[#allocation5 + $0x18c] ss:$16 sps:$4 sm:$0xff]  }
  0xa6   :  { %1846 = vmatpush2.bf16.msra.mxu1 %v3714_v29  ;;  %1804 = vmatprep.subr.bf16.mxu0 %v3719_v30  ;;  %v3806_v29 = vld [vmem:[#allocation5 + $0x3ac] ss:$16 sps:$4 sm:$0xff]   ;;  %v3801_v30 = vld [vmem:[#allocation5 + $0x188] ss:$16 sps:$4 sm:$0xff]  }
  0xa7   :  { %1847 = vmatprep.subr.bf16.mxu1 %v3722_v31  ;;  %v3804_v31 = vld [vmem:[#allocation5 + $0x3a8] ss:$16 sps:$4 sm:$0xff]  }
  0xa9   :  { %1805 = vmatpush2.bf16.msra.mxu0 %v3717_v32  ;;  %v3809_v32 = vld [vmem:[#allocation5 + $0x16c] ss:$16 sps:$4 sm:$0xff]  }
  0xaa   :  { %1848 = vmatpush2.bf16.msra.mxu1 %v3720_v33  ;;  %1806 = vmatprep.subr.bf16.mxu0 %v3725_v34  ;;  %v3812_v33 = vld [vmem:[#allocation5 + $0x38c] ss:$16 sps:$4 sm:$0xff]   ;;  %v3807_v34 = vld [vmem:[#allocation5 + $0x168] ss:$16 sps:$4 sm:$0xff]  }
  0xab   :  { %1849 = vmatprep.subr.bf16.mxu1 %v3728_v35  ;;  %v3810_v35 = vld [vmem:[#allocation5 + $0x388] ss:$16 sps:$4 sm:$0xff]  }
  0xad   :  { %1807 = vmatpush2.bf16.msra.mxu0 %v3723_v36  ;;  %v3815_v36 = vld [vmem:[#allocation5 + $0x14c] ss:$16 sps:$4 sm:$0xff]  }
  0xae   :  { %1850 = vmatpush2.bf16.msra.mxu1 %v3726_v38  ;;  %1808 = vmatprep.subr.bf16.mxu0 %v3735_v39  ;;  %v3813_v38 = vld [vmem:[#allocation5 + $0x148] ss:$16 sps:$4 sm:$0xff]  }
  0xaf   :  { %1860 = vmatprep.subr.bf16.mxu1 %v3738_v40  ;;  %v3816_v39 = vld [vmem:[#allocation5 + $0x368] ss:$16 sps:$4 sm:$0xff]   ;;  %v3821_v40 = vld [vmem:[#allocation5 + $0x12c] ss:$16 sps:$4 sm:$0xff]  }
  0xb1   :  { %1852 = vmatmul.mubr.bf16.vlgmr.msra.gmra.mxu1 %v4338_v42  ;;  %1809 = vmatpush2.bf16.msra.mxu0 %v3733_v41  ;;  %v3824_v41 = vld [vmem:[#allocation5 + $0x34c] ss:$16 sps:$4 sm:$0xff]  }
  0xb2   :  { %1861 = vmatpush1.bf16.msra.mxu1 %v3736_v44  ;;  %1901 = vmatprep.subr.bf16.mxu0 %v3746_v47  ;;  %v3822_v44 = vld [vmem:[#allocation5 + $0x348] ss:$16 sps:$4 sm:$0xff]   ;;  %v3830_v47 = vld [vmem:[#allocation5 + $0x32c] ss:$16 sps:$4 sm:$0xff]  }
  0xb3   :  { %1862 = vmatprep.subr.bf16.mxu1 %v3743_v45  ;;  %1892 = vmatprep.mubr.bf16.mxu1 %v4299_v6  ;;  %v3764_v6 = vld [vmem:[#allocation5 + $0x28c] ss:$16 sps:$4 sm:$0xff]  }
  0xb4   :  { %1811 = vmatmul.mubr.bf16.vlgmr.msra.gmra.mxu0 %v4343_v48  ;;  %v3827_v45 = vld [vmem:[#allocation5 + $0x10c] ss:$16 sps:$4 sm:$0xff]  }
  0xb5   :  { %1902 = vmatpush1.bf16.msra.mxu0 %v3744_v50  ;;  %1933 = vmatprep.mubr.bf16.mxu0 %v4301_v9  ;;  %v3768_v9 = vld [vmem:[#allocation5 + $0x268] ss:$16 sps:$4 sm:$0xff]  }
  0xb6   :  { %1863 = vmatpush1.bf16.msra.mxu1 %v3741_v49  ;;  %1903 = vmatprep.subr.bf16.mxu0 %v3752_v52  ;;  %v3825_v49 = vld [vmem:[#allocation5 + $0x108] ss:$16 sps:$4 sm:$0xff]   ;;  %v3836_v52 = vld [vmem:[#allocation5 + $0x4ec] ss:$16 sps:$4 sm:$0xff]  }
  0xb7   :  { %1864 = vmatprep.subr.bf16.mxu1 %v3749_v51  ;;  %v3828_v50 = vld [vmem:[#allocation5 + $0x328] ss:$16 sps:$4 sm:$0xff]   ;;  %v3833_v51 = vld [vmem:[#allocation5 + $0x30c] ss:$16 sps:$4 sm:$0xff]  }
  0xb9   :  { %1904 = vmatpush1.bf16.msra.mxu0 %v3750_v55  ;;  %v3834_v55 = vld [vmem:[#allocation5 + $0x4e8] ss:$16 sps:$4 sm:$0xff]  }
  0xba   :  { %1865 = vmatpush1.bf16.msra.mxu1 %v3747_v54  ;;  %1905 = vmatprep.subr.bf16.mxu0 %v3758_v57  ;;  %v3831_v54 = vld [vmem:[#allocation5 + $0x308] ss:$16 sps:$4 sm:$0xff]   ;;  %v3842_v57 = vld [vmem:[#allocation5 + $0x6ec] ss:$16 sps:$4 sm:$0xff]  }
  0xbb   :  { %1866 = vmatprep.subr.bf16.mxu1 %v3755_v56  ;;  %v3839_v56 = vld [vmem:[#allocation5 + $0x4cc] ss:$16 sps:$4 sm:$0xff]  }
  0xbd   :  { %1906 = vmatpush1.bf16.msra.mxu0 %v3756_v59  ;;  %v3840_v59 = vld [vmem:[#allocation5 + $0x6e8] ss:$16 sps:$4 sm:$0xff]  }
  0xbe   :  { %1867 = vmatpush1.bf16.msra.mxu1 %v3753_v58  ;;  %1907 = vmatprep.subr.bf16.mxu0 %v3764_v6  ;;  %v3837_v58 = vld [vmem:[#allocation5 + $0x4c8] ss:$16 sps:$4 sm:$0xff]   ;;  %v3848_v6 = vld [vmem:[#allocation5 + $0x6cc] ss:$16 sps:$4 sm:$0xff]  }
  0xbf   :  { %1868 = vmatprep.subr.bf16.mxu1 %v3761_v60  ;;  %v3845_v60 = vld [vmem:[#allocation5 + $0x4ac] ss:$16 sps:$4 sm:$0xff]  }
  0xc1   :  { %1908 = vmatpush1.bf16.msra.mxu0 %v3762_v62  ;;  %v3846_v62 = vld [vmem:[#allocation5 + $0x6c8] ss:$16 sps:$4 sm:$0xff]  }
  0xc2   :  { %1869 = vmatpush1.bf16.msra.mxu1 %v3759_v61  ;;  %1909 = vmatprep.subr.bf16.mxu0 %v3770_v0  ;;  %v3843_v61 = vld [vmem:[#allocation5 + $0x4a8] ss:$16 sps:$4 sm:$0xff]   ;;  %v3854_v0 = vld [vmem:[#allocation5 + $0x6ac] ss:$16 sps:$4 sm:$0xff]  }
  0xc3   :  { %1870 = vmatprep.subr.bf16.mxu1 %v3767_v63  ;;  %v3851_v63 = vld [vmem:[#allocation5 + $0x48c] ss:$16 sps:$4 sm:$0xff]  }
  0xc5   :  { %1910 = vmatpush1.bf16.msra.mxu0 %v3768_v9  ;;  %v3857_v9 = vld [vmem:[#allocation5 + $0x46c] ss:$16 sps:$4 sm:$0xff]  }
  0xc6   :  { %1871 = vmatpush1.bf16.msra.mxu1 %v3765_v1  ;;  %1911 = vmatprep.subr.bf16.mxu0 %v3776_v4  ;;  %v3849_v1 = vld [vmem:[#allocation5 + $0x488] ss:$16 sps:$4 sm:$0xff]   ;;  %v3863_v4 = vld [vmem:[#allocation5 + $0x44c] ss:$16 sps:$4 sm:$0xff]  }
  0xc7   :  { %1872 = vmatprep.subr.bf16.mxu1 %v3773_v3  ;;  %v3860_v3 = vld [vmem:[#allocation5 + $0x68c] ss:$16 sps:$4 sm:$0xff]  }
  0xc9   :  { %1912 = vmatpush1.bf16.msra.mxu0 %v3774_v7  ;;  %v3861_v7 = vld [vmem:[#allocation5 + $0x448] ss:$16 sps:$4 sm:$0xff]  }
  0xca   :  { %1873 = vmatpush1.bf16.msra.mxu1 %v3771_v5  ;;  %1913 = vmatprep.subr.bf16.mxu0 %v3782_v11  ;;  %v3866_v5 = vld [vmem:[#allocation5 + $0x66c] ss:$16 sps:$4 sm:$0xff]  }
  0xcb   :  { %1874 = vmatprep.subr.bf16.mxu1 %v3779_v10  ;;  %v3864_v10 = vld [vmem:[#allocation5 + $0x668] ss:$16 sps:$4 sm:$0xff]   ;;  %v3869_v11 = vld [vmem:[#allocation5 + $0x42c] ss:$16 sps:$4 sm:$0xff]  }
  0xcd   :  { %1914 = vmatpush1.bf16.msra.mxu0 %v3780_v13  ;;  %v3870_v13 = vld [vmem:[#allocation5 + $0x648] ss:$16 sps:$4 sm:$0xff]  }
  0xce   :  { %1875 = vmatpush1.bf16.msra.mxu1 %v3777_v12  ;;  %1915 = vmatprep.subr.bf16.mxu0 %v3788_v15  ;;  %v3872_v12 = vld [vmem:[#allocation5 + $0x64c] ss:$16 sps:$4 sm:$0xff]  }
  0xcf   :  { %1876 = vmatprep.subr.bf16.mxu1 %v3785_v14  ;;  %v3875_v14 = vld [vmem:[#allocation5 + $0x40c] ss:$16 sps:$4 sm:$0xff]  }
  0xd0   :  { %v3878_v15 = vld [vmem:[#allocation5 + $0x62c] ss:$16 sps:$4 sm:$0xff]  }
  0xd1   :  { %1916 = vmatpush1.bf16.msra.mxu0 %v3786_v17  ;;  %v3876_v17 = vld [vmem:[#allocation5 + $0x628] ss:$16 sps:$4 sm:$0xff]  }
  0xd2   :  { %1877 = vmatpush2.bf16.msra.mxu1 %v3783_v16  ;;  %1917 = vmatprep.subr.bf16.mxu0 %v3794_v19  ;;  %v3873_v16 = vld [vmem:[#allocation5 + $0x408] ss:$16 sps:$4 sm:$0xff]   ;;  %v3884_v19 = vld [vmem:[#allocation5 + $0x60c] ss:$16 sps:$4 sm:$0xff]  }
  0xd3   :  { %1878 = vmatprep.subr.bf16.mxu1 %v3791_v18  ;;  %v3881_v18 = vld [vmem:[#allocation5 + $0x5ec] ss:$16 sps:$4 sm:$0xff]  }
  0xd5   :  { %1918 = vmatpush2.bf16.msra.mxu0 %v3792_v21  ;;  %v3879_v21 = vld [vmem:[#allocation5 + $0x5e8] ss:$16 sps:$4 sm:$0xff]  }
  0xd6   :  { %1879 = vmatpush2.bf16.msra.mxu1 %v3789_v20  ;;  %1919 = vmatprep.subr.bf16.mxu0 %v3800_v25  ;;  %v428_v20 = vld [vmem:[#allocation5 + $0x7c8] sm:$0xff] }
  0xd7   :  { %1880 = vmatprep.subr.bf16.mxu1 %v3797_v24  ;;  %v3882_v24 = vld [vmem:[#allocation5 + $0x608] ss:$16 sps:$4 sm:$0xff]   ;;  %v3887_v25 = vld [vmem:[#allocation5 + $0x5cc] ss:$16 sps:$4 sm:$0xff]  }
  0xd9   :  { %1920 = vmatpush2.bf16.msra.mxu0 %v3798_v27  ;;  %v3394_v27 = vcombine.low %v428_v20, %v428_v20 }
  0xda   :  { %1881 = vmatpush2.bf16.msra.mxu1 %v3795_v26  ;;  %1921 = vmatprep.subr.bf16.mxu0 %v3806_v29  ;;  %v3395_v26 = vcombine.high %v428_v20, %v428_v20  ;;  %v4025_v20 = vld [vmem:[#allocation7 + $0x2c0] ss:$16 sps:$4 sm:$0xff]  }
  0xdb   :  { %1882 = vmatprep.subr.bf16.mxu1 %v3803_v28  ;;  %v3885_v28 = vld [vmem:[#allocation5 + $0x5c8] ss:$16 sps:$4 sm:$0xff]   ;;  %v1691_v29 = vsel %vm1683_vm1, %v3394_v27, 0  ;;  %v4030_v27 = vld [vmem:[#allocation7 + $0x2a4] ss:$16 sps:$4 sm:$0xff]  }
  0xdd   :  { %1922 = vmatpush2.bf16.msra.mxu0 %v3804_v31  ;;  %v3895_v31 = vld [vmem:[#allocation5 + $0x7ac] ss:$16 sps:$4 sm:$0xff]  }
  0xde   :  { %1883 = vmatpush2.bf16.msra.mxu1 %v3801_v30  ;;  %1923 = vmatprep.subr.bf16.mxu0 %v3812_v33  ;;  %v3892_v30 = vld [vmem:[#allocation5 + $0x5ac] ss:$16 sps:$4 sm:$0xff]   ;;  %v3893_v33 = vld [vmem:[#allocation5 + $0x7a8] ss:$16 sps:$4 sm:$0xff]  }
  0xdf   :  { %1884 = vmatprep.subr.bf16.mxu1 %v3809_v32  ;;  %v3890_v32 = vld [vmem:[#allocation5 + $0x5a8] ss:$16 sps:$4 sm:$0xff]  }
  0xe1   :  { %1924 = vmatpush2.bf16.msra.mxu0 %v3810_v35  ;;  %v3901_v35 = vld [vmem:[#allocation5 + $0x78c] ss:$16 sps:$4 sm:$0xff]  }
  0xe2   :  { %1885 = vmatpush2.bf16.msra.mxu1 %v3807_v34  ;;  %1925 = vmatprep.subr.bf16.mxu0 %v3818_v37  ;;  %v3898_v34 = vld [vmem:[#allocation5 + $0x58c] ss:$16 sps:$4 sm:$0xff]   ;;  %v3899_v37 = vld [vmem:[#allocation5 + $0x788] ss:$16 sps:$4 sm:$0xff]  }
  0xe3   :  { %1886 = vmatprep.subr.bf16.mxu1 %v3815_v36  ;;  %v3896_v36 = vld [vmem:[#allocation5 + $0x588] ss:$16 sps:$4 sm:$0xff]  }
  0xe5   :  { %1926 = vmatpush2.bf16.msra.mxu0 %v3816_v39  ;;  %v3907_v39 = vld [vmem:[#allocation5 + $0x76c] ss:$16 sps:$4 sm:$0xff]  }
  0xe6   :  { %1887 = vmatpush2.bf16.msra.mxu1 %v3813_v38  ;;  %1927 = vmatprep.subr.bf16.mxu0 %v3824_v41  ;;  %v3904_v38 = vld [vmem:[#allocation5 + $0x56c] ss:$16 sps:$4 sm:$0xff]   ;;  %v3905_v41 = vld [vmem:[#allocation5 + $0x768] ss:$16 sps:$4 sm:$0xff]  }
  0xe7   :  { %1888 = vmatprep.subr.bf16.mxu1 %v3821_v40  ;;  %v3902_v40 = vld [vmem:[#allocation5 + $0x568] ss:$16 sps:$4 sm:$0xff]  }
  0xe9   :  { %1928 = vmatpush2.bf16.msra.mxu0 %v3822_v44  ;;  %v3913_v44 = vld [vmem:[#allocation5 + $0x74c] ss:$16 sps:$4 sm:$0xff]  }
  0xea   :  { %1889 = vmatpush2.bf16.msra.mxu1 %v3819_v43  ;;  %1929 = vmatprep.subr.bf16.mxu0 %v3830_v47  ;;  %v3910_v43 = vld [vmem:[#allocation5 + $0x54c] ss:$16 sps:$4 sm:$0xff]   ;;  %v3911_v47 = vld [vmem:[#allocation5 + $0x748] ss:$16 sps:$4 sm:$0xff]  }
  0xeb   :  { %1890 = vmatprep.subr.bf16.mxu1 %v3827_v45  ;;  %v3908_v45 = vld [vmem:[#allocation5 + $0x548] ss:$16 sps:$4 sm:$0xff]  }
  0xed   :  { %1930 = vmatpush2.bf16.msra.mxu0 %v3828_v50  ;;  %v3919_v50 = vld [vmem:[#allocation5 + $0x72c] ss:$16 sps:$4 sm:$0xff]  }
  0xee   :  { %1891 = vmatpush2.bf16.msra.mxu1 %v3825_v49  ;;  %1931 = vmatprep.subr.bf16.mxu0 %v3833_v51  ;;  %v3916_v49 = vld [vmem:[#allocation5 + $0x52c] ss:$16 sps:$4 sm:$0xff]   ;;  %v3914_v51 = vld [vmem:[#allocation5 + $0x528] ss:$16 sps:$4 sm:$0xff]  }
  0xef   :  { %1942 = vmatprep.subr.bf16.mxu1 %v3836_v52  ;;  %v3917_v52 = vld [vmem:[#allocation5 + $0x728] ss:$16 sps:$4 sm:$0xff]  }
  0xf1   :  { %1893 = vmatmul.mubr.bf16.vlgmr.msra.gmra.mxu1 %v4305_v22  ;;  %1932 = vmatpush2.bf16.msra.mxu0 %v3831_v54  ;;  %v3852_v22 = vld [vmem:[#allocation5 + $0x6a8] ss:$16 sps:$4 sm:$0xff]   ;;  %v3922_v54 = vld [vmem:[#allocation5 + $0x50c] ss:$16 sps:$4 sm:$0xff]  }
  0xf2   :  { %1943 = vmatpush1.bf16.msra.mxu1 %v3834_v55  ;;  %1983 = vmatprep.subr.bf16.mxu0 %v3842_v57  ;;  %v3925_v55 = vld [vmem:[#allocation5 + $0x70c] ss:$16 sps:$4 sm:$0xff]   ;;  %v3923_v57 = vld [vmem:[#allocation5 + $0x708] ss:$16 sps:$4 sm:$0xff]  }
  0xf3   :  { %1944 = vmatprep.subr.bf16.mxu1 %v3839_v56  ;;  %1974 = vmatprep.mubr.bf16.mxu1 %v4331_v8  ;;  %v3858_v8 = vld [vmem:[#allocation5 + $0x688] ss:$16 sps:$4 sm:$0xff]  }
  0xf4   :  { %1934 = vmatmul.mubr.bf16.vlgmr.msra.gmra.mxu0 %v4307_v23  ;;  %v3855_v23 = vld [vmem:[#allocation5 + $0x468] ss:$16 sps:$4 sm:$0xff]  }
  0xf5   :  { %1984 = vmatpush1.bf16.msra.mxu0 %v3840_v59  ;;  %3399 = vmatprep.mubr.msk.bf16.mxu0 %vm1679_vm0, %v4325_v2  ;;  %v3867_v2 = vld [vmem:[#allocation5 + $0x428] ss:$16 sps:$4 sm:$0xff]   ;;  %v3926_v59 = vld [vmem:[#allocation7 + $0xe0] ss:$16 sps:$4 sm:$0xff]  }
  0xf6   :  { %1945 = vmatpush1.bf16.msra.mxu1 %v3837_v58  ;;  %1985 = vmatprep.subr.bf16.mxu0 %v3848_v6  ;;  %v3920_v56 = vld [vmem:[#allocation5 + $0x508] ss:$16 sps:$4 sm:$0xff]   ;;  %v3928_v58 = vld [vmem:[#allocation7 + $0xe4] ss:$16 sps:$4 sm:$0xff]   ;;  %v3929_v6 = vld [vmem:[#allocation7 + $0xc0] ss:$16 sps:$4 sm:$0xff]  }
  0xf7   :  { %1946 = vmatprep.subr.bf16.mxu1 %v3845_v60  ;;  %v3931_v60 = vld [vmem:[#allocation7 + $0xc4] ss:$16 sps:$4 sm:$0xff]  }
  0xf9   :  { %1986 = vmatpush1.bf16.msra.mxu0 %v3846_v62 }
  0xfa   :  { %1947 = vmatpush1.bf16.msra.mxu1 %v3843_v61  ;;  %1987 = vmatprep.subr.bf16.mxu0 %v3854_v0  ;;  %v3934_v61 = vld [vmem:[#allocation7 + $0xa4] ss:$16 sps:$4 sm:$0xff]  }
  0xfb   :  { %1948 = vmatprep.subr.bf16.mxu1 %v3851_v63 }
  0xfd   :  { %1988 = vmatpush1.bf16.msra.mxu0 %v3852_v22 }
  0xfe   :  { %1949 = vmatpush1.bf16.msra.mxu1 %v3849_v1  ;;  %1989 = vmatprep.subr.bf16.mxu0 %v3860_v3  ;;  %v3932_v1 = vld [vmem:[#allocation7 + $0xa0] ss:$16 sps:$4 sm:$0xff]   ;;  %v3937_v3 = vld [vmem:[#allocation7 + $0x84] ss:$16 sps:$4 sm:$0xff]  }
  0xff   :  { %1950 = vmatprep.subr.bf16.mxu1 %v3857_v9 }
 0x101   :  { %1990 = vmatpush1.bf16.msra.mxu0 %v3858_v8 }
 0x102   :  { %1951 = vmatpush1.bf16.msra.mxu1 %v3855_v23  ;;  %1991 = vmatprep.subr.bf16.mxu0 %v3866_v5  ;;  %v3940_v5 = vld [vmem:[#allocation7 + $0x64] ss:$16 sps:$4 sm:$0xff]  }
 0x103   :  { %1952 = vmatprep.subr.bf16.mxu1 %v3863_v4 }
 0x105   :  { %1992 = vmatpush1.bf16.msra.mxu0 %v3864_v10  ;;  %v3943_v10 = vld [vmem:[#allocation7 + $0x44] ss:$16 sps:$4 sm:$0xff]  }
 0x106   :  { %1953 = vmatpush1.bf16.msra.mxu1 %v3861_v7  ;;  %1993 = vmatprep.subr.bf16.mxu0 %v3872_v12  ;;  %v3938_v7 = vld [vmem:[#allocation7 + $0x60] ss:$16 sps:$4 sm:$0xff]   ;;  %v3946_v12 = vld [vmem:[#allocation7 + $0x24] ss:$16 sps:$4 sm:$0xff]  }
 0x107   :  { %1954 = vmatprep.subr.bf16.mxu1 %v3869_v11  ;;  %v3941_v11 = vld [vmem:[#allocation7 + $0x40] ss:$16 sps:$4 sm:$0xff]  }
 0x109   :  { %1994 = vmatpush1.bf16.msra.mxu0 %v3870_v13  ;;  %v3949_v13 = vld [vmem:[#allocation7 + $0x4] ss:$16 sps:$4 sm:$0xff]  }
 0x10a   :  { %1955 = vmatpush1.bf16.msra.mxu1 %v3867_v2  ;;  %1995 = vmatprep.subr.bf16.mxu0 %v3878_v15  ;;  %v3944_v2 = vld [vmem:[#allocation7 + $0x20] ss:$16 sps:$4 sm:$0xff]   ;;  %v3952_v15 = vld [vmem:[#allocation7 + $0x1e4] ss:$16 sps:$4 sm:$0xff]  }
 0x10b   :  { %1956 = vmatprep.subr.bf16.mxu1 %v3875_v14  ;;  %v3947_v14 = vld [vmem:[#allocation7] ss:$16 sps:$4 sm:$0xff]  }
 0x10d   :  { %1996 = vmatpush1.bf16.msra.mxu0 %v3876_v17  ;;  %v4021_v17 = vld [vmem:[#allocation7 + $0x2e4] ss:$16 sps:$4 sm:$0xff]  }
 0x10e   :  { %1957 = vmatpush1.bf16.msra.mxu1 %v3873_v16  ;;  %1997 = vmatprep.subr.bf16.mxu0 %v3884_v19  ;;  %v4019_v16 = vld [vmem:[#allocation7 + $0x2e0] ss:$16 sps:$4 sm:$0xff]   ;;  %v3955_v19 = vld [vmem:[#allocation7 + $0x1c4] ss:$16 sps:$4 sm:$0xff]  }
 0x10f   :  { %1958 = vmatprep.subr.bf16.mxu1 %v3881_v18  ;;  %v3950_v18 = vld [vmem:[#allocation7 + $0x1e0] ss:$16 sps:$4 sm:$0xff]  }
 0x111   :  { %1998 = vmatpush1.bf16.msra.mxu0 %v3882_v24  ;;  %v3953_v24 = vld [vmem:[#allocation7 + $0x1c0] ss:$16 sps:$4 sm:$0xff]  }
 0x112   :  { %1959 = vmatpush2.bf16.msra.mxu1 %v3879_v21  ;;  %3398 = vmatprep.subr.msk.bf16.mxu0 %vm1683_vm1, %v3395_v26  ;;  %v4027_v21 = vld [vmem:[#allocation7 + $0x2c4] ss:$16 sps:$4 sm:$0xff]   ;;  %v4028_v26 = vld [vmem:[#allocation7 + $0x2a0] ss:$16 sps:$4 sm:$0xff]  }
 0x113   :  { %1960 = vmatprep.subr.bf16.mxu1 %v3887_v25  ;;  %v3958_v25 = vld [vmem:[#allocation7 + $0x1a4] ss:$16 sps:$4 sm:$0xff]  }
 0x115   :  { %2002 = vmatpush2.bf16.msra.mxu0 %v1691_v29  ;;  %v3956_v29 = vld [vmem:[#allocation7 + $0x1a0] ss:$16 sps:$4 sm:$0xff]  }
 0x116   :  { %1961 = vmatpush2.bf16.msra.mxu1 %v3885_v28  ;;  %2003 = vmatprep.subr.bf16.mxu0 %v3895_v31  ;;  %v4033_v28 = vld [vmem:[#allocation7 + $0x284] ss:$16 sps:$4 sm:$0xff]   ;;  %v4031_v31 = vld [vmem:[#allocation7 + $0x280] ss:$16 sps:$4 sm:$0xff]  }
 0x117   :  { %1962 = vmatprep.subr.bf16.mxu1 %v3892_v30  ;;  %v3961_v30 = vld [vmem:[#allocation7 + $0x184] ss:$16 sps:$4 sm:$0xff]  }
 0x119   :  { %2004 = vmatpush2.bf16.msra.mxu0 %v3893_v33  ;;  %v3959_v33 = vld [vmem:[#allocation7 + $0x180] ss:$16 sps:$4 sm:$0xff]  }
 0x11a   :  { %1963 = vmatpush2.bf16.msra.mxu1 %v3890_v32  ;;  %2005 = vmatprep.subr.bf16.mxu0 %v3901_v35  ;;  %v4036_v32 = vld [vmem:[#allocation7 + $0x264] ss:$16 sps:$4 sm:$0xff]   ;;  %v4034_v35 = vld [vmem:[#allocation7 + $0x260] ss:$16 sps:$4 sm:$0xff]  }
 0x11b   :  { %1964 = vmatprep.subr.bf16.mxu1 %v3898_v34  ;;  %v3964_v34 = vld [vmem:[#allocation7 + $0x164] ss:$16 sps:$4 sm:$0xff]  }
 0x11d   :  { %2006 = vmatpush2.bf16.msra.mxu0 %v3899_v37  ;;  %v3962_v37 = vld [vmem:[#allocation7 + $0x160] ss:$16 sps:$4 sm:$0xff]  }
 0x11e   :  { %1965 = vmatpush2.bf16.msra.mxu1 %v3896_v36  ;;  %2007 = vmatprep.subr.bf16.mxu0 %v3907_v39  ;;  %v4039_v36 = vld [vmem:[#allocation7 + $0x244] ss:$16 sps:$4 sm:$0xff]   ;;  %v4037_v39 = vld [vmem:[#allocation7 + $0x240] ss:$16 sps:$4 sm:$0xff]  }
 0x11f   :  { %1966 = vmatprep.subr.bf16.mxu1 %v3904_v38  ;;  %v3967_v38 = vld [vmem:[#allocation7 + $0x144] ss:$16 sps:$4 sm:$0xff]  }
 0x121   :  { %2008 = vmatpush2.bf16.msra.mxu0 %v3905_v41  ;;  %v3965_v41 = vld [vmem:[#allocation7 + $0x140] ss:$16 sps:$4 sm:$0xff]  }
 0x122   :  { %1967 = vmatpush2.bf16.msra.mxu1 %v3902_v40  ;;  %2009 = vmatprep.subr.bf16.mxu0 %v3913_v44  ;;  %v4042_v40 = vld [vmem:[#allocation7 + $0x224] ss:$16 sps:$4 sm:$0xff]   ;;  %v4040_v44 = vld [vmem:[#allocation7 + $0x220] ss:$16 sps:$4 sm:$0xff]  }
 0x123   :  { %1968 = vmatprep.subr.bf16.mxu1 %v3910_v43  ;;  %v3970_v43 = vld [vmem:[#allocation7 + $0x124] ss:$16 sps:$4 sm:$0xff]  }
 0x125   :  { %2010 = vmatpush2.bf16.msra.mxu0 %v3911_v47  ;;  %v3968_v47 = vld [vmem:[#allocation7 + $0x120] ss:$16 sps:$4 sm:$0xff]  }
 0x126   :  { %1969 = vmatpush2.bf16.msra.mxu1 %v3908_v45  ;;  %2011 = vmatprep.subr.bf16.mxu0 %v3919_v50  ;;  %v4045_v45 = vld [vmem:[#allocation7 + $0x204] ss:$16 sps:$4 sm:$0xff]   ;;  %v4043_v50 = vld [vmem:[#allocation7 + $0x200] ss:$16 sps:$4 sm:$0xff]  }
 0x127   :  { %1970 = vmatprep.subr.bf16.mxu1 %v3916_v49  ;;  %v3973_v49 = vld [vmem:[#allocation7 + $0x104] ss:$16 sps:$4 sm:$0xff]  }
 0x129   :  { %2012 = vmatpush2.bf16.msra.mxu0 %v3917_v52  ;;  %v3971_v52 = vld [vmem:[#allocation7 + $0x100] ss:$16 sps:$4 sm:$0xff]  }
 0x12a   :  { %1971 = vmatpush2.bf16.msra.mxu1 %v3914_v51  ;;  %2013 = vmatprep.subr.bf16.mxu0 %v3925_v55  ;;  %v4048_v51 = vld [vmem:[#allocation7 + $0x3e4] ss:$16 sps:$4 sm:$0xff]   ;;  %v4046_v55 = vld [vmem:[#allocation7 + $0x3e0] ss:$16 sps:$4 sm:$0xff]  }
 0x12b   :  { %1972 = vmatprep.subr.bf16.mxu1 %v3922_v54  ;;  %v3976_v54 = vld [vmem:[#allocation7 + $0xec] ss:$16 sps:$4 sm:$0xff]  }
 0x12d   :  { %2014 = vmatpush2.bf16.msra.mxu0 %v3923_v57  ;;  %v4051_v57 = vld [vmem:[#allocation7 + $0x3c4] ss:$16 sps:$4 sm:$0xff]  }
 0x12e   :  { %1973 = vmatpush2.bf16.msra.mxu1 %v3920_v56  ;;  %2816 = vmatprep.subr.bf16.mxu0 %v3928_v58  ;;  %v4049_v58 = vld [vmem:[#allocation7 + $0x3c0] ss:$16 sps:$4 sm:$0xff]  }
 0x12f   :  { %2857 = vmatprep.subr.bf16.mxu1 %v4021_v17 }
 0x130   :  { %2016 = vmatmul.mubr.bf16.vlgmr.msra.gmra.mxu0 %v4338_v42  ;;  %v3935_v42 = vld [vmem:[#allocation7 + $0x80] ss:$16 sps:$4 sm:$0xff]  }
 0x131   :  { %1975 = vmatmul.mubr.bf16.vlgmr.msra.gmra.mxu1 %v4343_v48  ;;  %2817 = vmatpush1.bf16.msra.mxu0 %v3926_v59 }
 0x132   :  { %2818 = vmatprep.subr.bf16.mxu0 %v3931_v60  ;;  %2858 = vmatpush1.bf16.msra.mxu1 %v4019_v16  ;;  %v4069_v16 = vld [vmem:[#allocation7 + $0x304] ss:$16 sps:$4 sm:$0xff]  }
 0x133   :  { %2859 = vmatprep.subr.bf16.mxu1 %v4027_v21 }
 0x134   :  { %v1730_v62 = vpop.f32.mrf.mxu0 }
 0x135   :  { %v1771_v63 = vpop.f32.mrf.mxu1  ;;  %2819 = vmatpush1.bf16.msra.mxu0 %v3929_v6 }
 0x136   :  { %v4357_v0 = vadd.f32 %v1771_v63, %v1730_v62  ;;  %v4359_v22 = vpop.f32.mrf.mxu0  ;;  %2820 = vmatprep.subr.bf16.mxu0 %v3934_v61  ;;  %2860 = vmatpush1.bf16.msra.mxu1 %v4025_v20  ;;  %v4054_v61 = vld [vmem:[#allocation7 + $0x3a4] ss:$16 sps:$4 sm:$0xff]  }
 0x137   :  { %v4361_v9 = vpop.f32.mrf.mxu1  ;;  %2861 = vmatprep.subr.bf16.mxu1 %v4030_v27 }
 0x138   :  { %v1734_v23 = vpop.f32.mrf.mxu0  ;;  %v1774_v62 = vadd.f32 %v4361_v9, %v4359_v22  ;;  %v4060_v22 = vld [vmem:[#allocation7 + $0x364] ss:$16 sps:$4 sm:$0xff]   ;;  %v4058_v9 = vld [vmem:[#allocation7 + $0x360] ss:$16 sps:$4 sm:$0xff]  }
 0x139   :  { %v1775_v48 = vpop.f32.mrf.mxu1  ;;  %2821 = vmatpush1.bf16.msra.mxu0 %v3932_v1  ;;  %v4052_v1 = vld [vmem:[#allocation7 + $0x3a0] ss:$16 sps:$4 sm:$0xff]  }
 0x13a   :  { %v1735_v8 = vpop.f32.mrf.mxu0  ;;  %2822 = vmatprep.subr.bf16.mxu0 %v3937_v3  ;;  %2862 = vmatpush1.bf16.msra.mxu1 %v4028_v26  ;;  %v4072_v26 = vld [vmem:[#allocation7 + $0x2ec] ss:$16 sps:$4 sm:$0xff]  }
 0x13b   :  { %v1776_v4 = vpop.f32.mrf.mxu1  ;;  %2863 = vmatprep.subr.bf16.mxu1 %v4033_v28 }
 0x13c   :  { %v4057_v4 = vld [vmem:[#allocation7 + $0x384] ss:$16 sps:$4 sm:$0xff]  }
 0x13d   :  { %2823 = vmatpush1.bf16.msra.mxu0 %v3935_v42 }
 0x13e   :  { %2824 = vmatprep.subr.bf16.mxu0 %v3940_v5  ;;  %2864 = vmatpush1.bf16.msra.mxu1 %v4031_v31  ;;  %v3979_v31 = vld [vmem:[#allocation7 + $0xcc] ss:$16 sps:$4 sm:$0xff]  }
 0x13f   :  { %2865 = vmatprep.subr.bf16.mxu1 %v4036_v32  ;;  %v3977_v32 = vld [vmem:[#allocation7 + $0xc8] ss:$16 sps:$4 sm:$0xff]  }
 0x141   :  { %2825 = vmatpush1.bf16.msra.mxu0 %v3938_v7 }
 0x142   :  { %2826 = vmatprep.subr.bf16.mxu0 %v3943_v10  ;;  %2866 = vmatpush1.bf16.msra.mxu1 %v4034_v35  ;;  %v4055_v10 = vld [vmem:[#allocation7 + $0x380] ss:$16 sps:$4 sm:$0xff]   ;;  %v3985_v35 = vld [vmem:[#allocation7 + $0x8c] ss:$16 sps:$4 sm:$0xff]  }
 0x143   :  { %2867 = vmatprep.subr.bf16.mxu1 %v4039_v36  ;;  %v3983_v36 = vld [vmem:[#allocation7 + $0x88] ss:$16 sps:$4 sm:$0xff]  }
 0x145   :  { %2827 = vmatpush1.bf16.msra.mxu0 %v3941_v11 }
 0x146   :  { %2828 = vmatprep.subr.bf16.mxu0 %v3946_v12  ;;  %2868 = vmatpush1.bf16.msra.mxu1 %v4037_v39  ;;  %v4063_v12 = vld [vmem:[#allocation7 + $0x344] ss:$16 sps:$4 sm:$0xff]   ;;  %v3991_v39 = vld [vmem:[#allocation7 + $0x4c] ss:$16 sps:$4 sm:$0xff]  }
 0x147   :  { %2869 = vmatprep.subr.bf16.mxu1 %v4042_v40  ;;  %v3989_v40 = vld [vmem:[#allocation7 + $0x48] ss:$16 sps:$4 sm:$0xff]  }
 0x149   :  { %2829 = vmatpush1.bf16.msra.mxu0 %v3944_v2  ;;  %v4061_v2 = vld [vmem:[#allocation7 + $0x340] ss:$16 sps:$4 sm:$0xff]  }
 0x14a   :  { %2830 = vmatprep.subr.bf16.mxu0 %v3949_v13  ;;  %2870 = vmatpush1.bf16.msra.mxu1 %v4040_v44  ;;  %v4066_v13 = vld [vmem:[#allocation7 + $0x324] ss:$16 sps:$4 sm:$0xff]   ;;  %v3997_v44 = vld [vmem:[#allocation7 + $0xc] ss:$16 sps:$4 sm:$0xff]  }
 0x14b   :  { %2871 = vmatprep.subr.bf16.mxu1 %v4045_v45  ;;  %v3995_v45 = vld [vmem:[#allocation7 + $0x8] ss:$16 sps:$4 sm:$0xff]  }
 0x14d   :  { %2831 = vmatpush1.bf16.msra.mxu0 %v3947_v14  ;;  %v4064_v14 = vld [vmem:[#allocation7 + $0x320] ss:$16 sps:$4 sm:$0xff]  }
 0x14e   :  { %2832 = vmatprep.subr.bf16.mxu0 %v3952_v15  ;;  %2872 = vmatpush1.bf16.msra.mxu1 %v4043_v50  ;;  %v4067_v15 = vld [vmem:[#allocation7 + $0x300] ss:$16 sps:$4 sm:$0xff]  }
 0x14f   :  { %2873 = vmatprep.subr.bf16.mxu1 %v4048_v51  ;;  %v4003_v51 = vld [vmem:[#allocation7 + $0x1cc] ss:$16 sps:$4 sm:$0xff]  }
 0x151   :  { %2833 = vmatpush2.bf16.msra.mxu0 %v3950_v18 }
 0x152   :  { %2834 = vmatprep.subr.bf16.mxu0 %v3955_v19  ;;  %2874 = vmatpush2.bf16.msra.mxu1 %v4046_v55 }
 0x153   :  { %2875 = vmatprep.subr.bf16.mxu1 %v4051_v57  ;;  %v4006_v57 = vld [vmem:[#allocation7 + $0x1ac] ss:$16 sps:$4 sm:$0xff]  }
 0x155   :  { %2835 = vmatpush2.bf16.msra.mxu0 %v3953_v24 }
 0x156   :  { %2836 = vmatprep.subr.bf16.mxu0 %v3958_v25  ;;  %2876 = vmatpush2.bf16.msra.mxu1 %v4049_v58 }
 0x157   :  { %2877 = vmatprep.subr.bf16.mxu1 %v4054_v61  ;;  %v4009_v61 = vld [vmem:[#allocation7 + $0x18c] ss:$16 sps:$4 sm:$0xff]  }
 0x159   :  { %2837 = vmatpush2.bf16.msra.mxu0 %v3956_v29  ;;  %v3974_v29 = vld [vmem:[#allocation7 + $0xe8] ss:$16 sps:$4 sm:$0xff]  }
 0x15a   :  { %2838 = vmatprep.subr.bf16.mxu0 %v3961_v30  ;;  %2878 = vmatpush2.bf16.msra.mxu1 %v4052_v1  ;;  %v4012_v1 = vld [vmem:[#allocation7 + $0x16c] ss:$16 sps:$4 sm:$0xff]  }
 0x15b   :  { %2879 = vmatprep.subr.bf16.mxu1 %v4057_v4  ;;  %v4016_v4 = vld [vmem:[#allocation7 + $0x128] ss:$16 sps:$4 sm:$0xff]  }
 0x15d   :  { %2839 = vmatpush2.bf16.msra.mxu0 %v3959_v33  ;;  %v3982_v33 = vld [vmem:[#allocation7 + $0xac] ss:$16 sps:$4 sm:$0xff]  }
 0x15e   :  { %2840 = vmatprep.subr.bf16.mxu0 %v3964_v34  ;;  %2880 = vmatpush2.bf16.msra.mxu1 %v4055_v10  ;;  %v3980_v34 = vld [vmem:[#allocation7 + $0xa8] ss:$16 sps:$4 sm:$0xff]  }
 0x15f   :  { %2881 = vmatprep.subr.bf16.mxu1 %v4060_v22  ;;  %v4022_v10 = vld [vmem:[#allocation7 + $0x108] ss:$16 sps:$4 sm:$0xff]  }
 0x161   :  { %2841 = vmatpush2.bf16.msra.mxu0 %v3962_v37  ;;  %v3988_v37 = vld [vmem:[#allocation7 + $0x6c] ss:$16 sps:$4 sm:$0xff]  }
 0x162   :  { %2842 = vmatprep.subr.bf16.mxu0 %v3967_v38  ;;  %2882 = vmatpush2.bf16.msra.mxu1 %v4058_v9  ;;  %v3986_v38 = vld [vmem:[#allocation7 + $0x68] ss:$16 sps:$4 sm:$0xff]  }
 0x163   :  { %2883 = vmatprep.subr.bf16.mxu1 %v4063_v12 }
 0x165   :  { %2843 = vmatpush2.bf16.msra.mxu0 %v3965_v41  ;;  %v3994_v41 = vld [vmem:[#allocation7 + $0x2c] ss:$16 sps:$4 sm:$0xff]  }
 0x166   :  { %2844 = vmatprep.subr.bf16.mxu0 %v3970_v43  ;;  %2884 = vmatpush2.bf16.msra.mxu1 %v4061_v2  ;;  %v3992_v43 = vld [vmem:[#allocation7 + $0x28] ss:$16 sps:$4 sm:$0xff]  }
 0x167   :  { %2885 = vmatprep.subr.bf16.mxu1 %v4066_v13 }
 0x169   :  { %2845 = vmatpush2.bf16.msra.mxu0 %v3968_v47  ;;  %v4000_v47 = vld [vmem:[#allocation7 + $0x1ec] ss:$16 sps:$4 sm:$0xff]  }
 0x16a   :  { %2846 = vmatprep.subr.bf16.mxu0 %v3973_v49  ;;  %2886 = vmatpush2.bf16.msra.mxu1 %v4064_v14  ;;  %v3998_v49 = vld [vmem:[#allocation7 + $0x1e8] ss:$16 sps:$4 sm:$0xff]  }
 0x16b   :  { %2887 = vmatprep.subr.bf16.mxu1 %v4069_v16 }
 0x16d   :  { %2847 = vmatpush2.bf16.msra.mxu0 %v3971_v52 }
 0x16e   :  { %2898 = vmatprep.subr.bf16.mxu0 %v3976_v54  ;;  %2888 = vmatpush2.bf16.msra.mxu1 %v4067_v15  ;;  %v4001_v54 = vld [vmem:[#allocation7 + $0x1c8] ss:$16 sps:$4 sm:$0xff]  }
 0x16f   :  { %2939 = vmatprep.subr.bf16.mxu1 %v4072_v26 }
 0x171   :  { %v1853_v56 = vpop.f32.mrf.mxu1 }
 0x173   :  { %v1855_v59 = vpop.f32.mrf.mxu1 }
 0x174   :  { %v1812_v60 = vpop.f32.mrf.mxu0 }
 0x175   :  { %v1857_v6 = vpop.f32.mrf.mxu1  ;;  %v1813_v63 = vadd.f32 %v1812_v60, %v4357_v0  ;;  %v4004_v60 = vld [vmem:[#allocation7 + $0x1a8] ss:$16 sps:$4 sm:$0xff]  }
 0x176   :  { %v1814_v3 = vpop.f32.mrf.mxu0 }
 0x177   :  { %v1858_v23 = vpop.f32.mrf.mxu1  ;;  %v4366_v48 = vadd.f32 %v1853_v56, %v1813_v63  ;;  %v1815_v42 = vadd.f32 %v1814_v3, %v1774_v62  ;;  %v4007_v63 = vld [vmem:[#allocation7 + $0x188] ss:$16 sps:$4 sm:$0xff]  }
 0x178   :  { %v1816_v8 = vpop.f32.mrf.mxu0  ;;  %v4010_v3 = vld [vmem:[#allocation7 + $0x168] ss:$16 sps:$4 sm:$0xff]   ;;  %v4015_v23 = vld [vmem:[#allocation7 + $0x14c] ss:$16 sps:$4 sm:$0xff]  }
 0x179   :  { %v2028_v5 = vmul.f32 0.70710677, %v4366_v48  ;;  %v4369_v7 = vadd.f32 %v1855_v59, %v1815_v42  ;;  %v2024_v20 = vmul.f32 0.5, %v4366_v48  ;;  %v4013_v42 = vld [vmem:[#allocation7 + $0x148] ss:$16 sps:$4 sm:$0xff]  }
 0x17a   :  { %v1817_v11 = vpop.f32.mrf.mxu0  ;;  %v4018_v8 = vld [vmem:[#allocation7 + $0x12c] ss:$16 sps:$4 sm:$0xff]  }
 0x17b   :  { %4118 = verf.f32 %v2028_v5  ;;  %v2029_v0 = vmul.f32 0.70710677, %v4369_v7  ;;  %v2025_v21 = vmul.f32 0.5, %v4369_v7  ;;  %v4024_v5 = vld [vmem:[#allocation7 + $0x10c] ss:$16 sps:$4 sm:$0xff]  }
 0x17d   :  { %4120 = verf.f32 %v2029_v0 }
 0x188   :  { %v4119_v17 = vpop.eup %4118 }
 0x189   :  { %v2036_v18 = vadd.f32 1.0, %v4119_v17 }
 0x18a   :  { %v4121_v19 = vpop.eup %4120 }
 0x18b   :  { %v2037_v24 = vadd.f32 1.0, %v4121_v19  ;;  %v2040_v25 = vmul.f32 %v2036_v18, %v2024_v20 }
 0x18d   :  { %v2041_v27 = vmul.f32 %v2037_v24, %v2025_v21  ;;  %v4374_v30 = vpack.c.bf16 %v2040_v25, %v2040_v25 }
 0x18f   :  { %v2045_v28 = vpack.c.bf16 %v2041_v27, %v2041_v27 }
 0x191   :  { %2848 = vmatprep.mubr.bf16.mxu0 %v2045_v28 }
 0x192   :  { %2849 = vmatmul.mubr.bf16.vlgmr.msra.gmra.mxu0 %v4374_v30 }
 0x193   :  { %2899 = vmatpush1.bf16.msra.mxu0 %v3974_v29  ;;  %2930 = vmatprep.mubr.bf16.mxu0 %v2045_v28 }
 0x194   :  { %2900 = vmatprep.subr.bf16.mxu0 %v3979_v31 }
 0x197   :  { %2901 = vmatpush1.bf16.msra.mxu0 %v3977_v32 }
 0x198   :  { %2902 = vmatprep.subr.bf16.mxu0 %v3982_v33 }
 0x19b   :  { %2903 = vmatpush1.bf16.msra.mxu0 %v3980_v34  ;;  %v4070_v34 = vld [vmem:[#allocation7 + $0x2e8] ss:$16 sps:$4 sm:$0xff]  }
 0x19c   :  { %2904 = vmatprep.subr.bf16.mxu0 %v3985_v35 }
 0x19f   :  { %2905 = vmatpush1.bf16.msra.mxu0 %v3983_v36  ;;  %v4075_v36 = vld [vmem:[#allocation7 + $0x2cc] ss:$16 sps:$4 sm:$0xff]  }
 0x1a0   :  { %2906 = vmatprep.subr.bf16.mxu0 %v3988_v37  ;;  %v4073_v37 = vld [vmem:[#allocation7 + $0x2c8] ss:$16 sps:$4 sm:$0xff]  }
 0x1a3   :  { %2907 = vmatpush1.bf16.msra.mxu0 %v3986_v38  ;;  %v4078_v38 = vld [vmem:[#allocation7 + $0x2ac] ss:$16 sps:$4 sm:$0xff]  }
 0x1a4   :  { %2908 = vmatprep.subr.bf16.mxu0 %v3991_v39  ;;  %v4076_v39 = vld [vmem:[#allocation7 + $0x2a8] ss:$16 sps:$4 sm:$0xff]  }
 0x1a7   :  { %2909 = vmatpush1.bf16.msra.mxu0 %v3989_v40  ;;  %v4081_v40 = vld [vmem:[#allocation7 + $0x28c] ss:$16 sps:$4 sm:$0xff]  }
 0x1a8   :  { %2910 = vmatprep.subr.bf16.mxu0 %v3994_v41  ;;  %v4079_v41 = vld [vmem:[#allocation7 + $0x288] ss:$16 sps:$4 sm:$0xff]  }
 0x1ab   :  { %2911 = vmatpush1.bf16.msra.mxu0 %v3992_v43  ;;  %v4084_v43 = vld [vmem:[#allocation7 + $0x26c] ss:$16 sps:$4 sm:$0xff]  }
 0x1ac   :  { %2912 = vmatprep.subr.bf16.mxu0 %v3997_v44  ;;  %v4082_v44 = vld [vmem:[#allocation7 + $0x268] ss:$16 sps:$4 sm:$0xff]  }
 0x1af   :  { %2913 = vmatpush1.bf16.msra.mxu0 %v3995_v45  ;;  %v4087_v45 = vld [vmem:[#allocation7 + $0x24c] ss:$16 sps:$4 sm:$0xff]  }
 0x1b0   :  { %2914 = vmatprep.subr.bf16.mxu0 %v4000_v47  ;;  %v4085_v47 = vld [vmem:[#allocation7 + $0x248] ss:$16 sps:$4 sm:$0xff]  }
 0x1b1   :  { %v1894_v50 = vpop.f32.mrf.mxu1 }
 0x1b3   :  { %v1896_v52 = vpop.f32.mrf.mxu1  ;;  %2915 = vmatpush2.bf16.msra.mxu0 %v3998_v49  ;;  %v4090_v49 = vld [vmem:[#allocation7 + $0x22c] ss:$16 sps:$4 sm:$0xff]  }
 0x1b4   :  { %v1935_v56 = vpop.f32.mrf.mxu0  ;;  %2916 = vmatprep.subr.bf16.mxu0 %v4003_v51  ;;  %v4093_v51 = vld [vmem:[#allocation7 + $0x20c] ss:$16 sps:$4 sm:$0xff]  }
 0x1b5   :  { %v1898_v55 = vpop.f32.mrf.mxu1  ;;  %v1936_v11 = vadd.f32 %v1935_v56, %v1894_v50  ;;  %v4088_v50 = vld [vmem:[#allocation7 + $0x228] ss:$16 sps:$4 sm:$0xff]   ;;  %v4099_v56 = vld [vmem:[#allocation7 + $0x3cc] ss:$16 sps:$4 sm:$0xff]  }
 0x1b6   :  { %v1937_v59 = vpop.f32.mrf.mxu0  ;;  %v4094_v55 = vld [vmem:[#allocation7 + $0x3e8] ss:$16 sps:$4 sm:$0xff]  }
 0x1b7   :  { %v1899_v58 = vpop.f32.mrf.mxu1  ;;  %2917 = vmatpush2.bf16.msra.mxu0 %v4001_v54  ;;  %v1938_v9 = vadd.f32 %v1937_v59, %v1896_v52  ;;  %v4091_v52 = vld [vmem:[#allocation7 + $0x208] ss:$16 sps:$4 sm:$0xff]   ;;  %v4096_v54 = vld [vmem:[#allocation7 + $0x3ec] ss:$16 sps:$4 sm:$0xff]  }
 0x1b8   :  { %v1939_v6 = vpop.f32.mrf.mxu0  ;;  %2918 = vmatprep.subr.bf16.mxu0 %v4006_v57  ;;  %v4097_v57 = vld [vmem:[#allocation7 + $0x3c8] ss:$16 sps:$4 sm:$0xff]   ;;  %v4102_v58 = vld [vmem:[#allocation7 + $0x3ac] ss:$16 sps:$4 sm:$0xff]  }
 0x1b9   :  { %v4100_v59 = vld [vmem:[#allocation7 + $0x3a8] ss:$16 sps:$4 sm:$0xff]  }
 0x1ba   :  { %v1940_v62 = vpop.f32.mrf.mxu0  ;;  %v4103_v6 = vld [vmem:[#allocation7 + $0x388] ss:$16 sps:$4 sm:$0xff]  }
 0x1bb   :  { %2919 = vmatpush2.bf16.msra.mxu0 %v4004_v60  ;;  %v4105_v60 = vld [vmem:[#allocation7 + $0x38c] ss:$16 sps:$4 sm:$0xff]   ;;  %v4106_v62 = vld [vmem:[#allocation7 + $0x368] ss:$16 sps:$4 sm:$0xff]  }
 0x1bc   :  { %2920 = vmatprep.subr.bf16.mxu0 %v4009_v61  ;;  %v4108_v61 = vld [vmem:[#allocation7 + $0x36c] ss:$16 sps:$4 sm:$0xff]  }
 0x1bf   :  { %2921 = vmatpush2.bf16.msra.mxu0 %v4007_v63  ;;  %v4111_v63 = vld [vmem:[#allocation7 + $0x34c] ss:$16 sps:$4 sm:$0xff]  }
 0x1c0   :  { %2922 = vmatprep.subr.bf16.mxu0 %v4012_v1  ;;  %v4109_v1 = vld [vmem:[#allocation7 + $0x348] ss:$16 sps:$4 sm:$0xff]  }
 0x1c3   :  { %2923 = vmatpush2.bf16.msra.mxu0 %v4010_v3  ;;  %v4114_v3 = vld [vmem:[#allocation7 + $0x32c] ss:$16 sps:$4 sm:$0xff]  }
 0x1c4   :  { %2924 = vmatprep.subr.bf16.mxu0 %v4015_v23  ;;  %v4112_v23 = vld [vmem:[#allocation7 + $0x328] ss:$16 sps:$4 sm:$0xff]  }
 0x1c7   :  { %2925 = vmatpush2.bf16.msra.mxu0 %v4013_v42  ;;  %v4117_v42 = vld [vmem:[#allocation7 + $0x30c] ss:$16 sps:$4 sm:$0xff]  }
 0x1c8   :  { %2926 = vmatprep.subr.bf16.mxu0 %v4018_v8  ;;  %v4115_v8 = vld [vmem:[#allocation7 + $0x308] ss:$16 sps:$4 sm:$0xff]  }
 0x1cb   :  { %2927 = vmatpush2.bf16.msra.mxu0 %v4016_v4 }
 0x1cc   :  { %2928 = vmatprep.subr.bf16.mxu0 %v4024_v5 }
 0x1cf   :  { %2929 = vmatpush2.bf16.msra.mxu0 %v4022_v10 }
 0x1d2   :  { %2931 = vmatmul.mubr.bf16.vlgmr.msra.gmra.mxu0 %v4374_v30 }
 0x1f0   :  { %v2017_v22 = vpop.f32.mrf.mxu0 }
 0x1f1   :  { %v1976_v0 = vpop.f32.mrf.mxu1 }
 0x1f2   :  { %v1977_v12 = vadd.f32 %v1976_v0, %v1936_v11  ;;  %v2019_v13 = vpop.f32.mrf.mxu0 }
 0x1f3   :  { %v1978_v2 = vpop.f32.mrf.mxu1 }
 0x1f4   :  { %v4378_v14 = vadd.f32 %v2017_v22, %v1977_v12  ;;  %v1979_v15 = vadd.f32 %v1978_v2, %v1938_v9  ;;  %v2021_v17 = vpop.f32.mrf.mxu0 }
 0x1f5   :  { %v1980_v16 = vpop.f32.mrf.mxu1 }
 0x1f6   :  { %v2030_v18 = vmul.f32 0.70710677, %v4378_v14  ;;  %v4381_v19 = vadd.f32 %v2019_v13, %v1979_v15  ;;  %v2022_v21 = vpop.f32.mrf.mxu0  ;;  %v2026_v28 = vmul.f32 0.5, %v4378_v14 }
 0x1f7   :  { %v1981_v20 = vpop.f32.mrf.mxu1 }
 0x1f8   :  { %4122 = verf.f32 %v2030_v18  ;;  %v2031_v24 = vmul.f32 0.70710677, %v4381_v19  ;;  %v2027_v29 = vmul.f32 0.5, %v4381_v19 }
 0x1fa   :  { %4124 = verf.f32 %v2031_v24 }
 0x205   :  { %v4123_v25 = vpop.eup %4122 }
 0x206   :  { %v2038_v26 = vadd.f32 1.0, %v4123_v25 }
 0x207   :  { %v4125_v27 = vpop.eup %4124 }
 0x208   :  { %v2039_v30 = vadd.f32 1.0, %v4125_v27  ;;  %v2042_v31 = vmul.f32 %v2038_v26, %v2026_v28 }
 0x20a   :  { %v2043_v32 = vmul.f32 %v2039_v30, %v2027_v29  ;;  %v4386_v35 = vpack.c.bf16 %v2042_v31, %v2042_v31 }
 0x20c   :  { %v2047_v33 = vpack.c.bf16 %v2043_v32, %v2043_v32 }
 0x20e   :  { %2889 = vmatprep.mubr.bf16.mxu1 %v2047_v33 }
 0x20f   :  { %2890 = vmatmul.mubr.bf16.vlgmr.msra.gmra.mxu1 %v4386_v35 }
 0x210   :  { %2940 = vmatpush1.bf16.msra.mxu1 %v4070_v34  ;;  %2971 = vmatprep.mubr.bf16.mxu1 %v2047_v33 }
 0x211   :  { %2941 = vmatprep.subr.bf16.mxu1 %v4075_v36 }
 0x214   :  { %2942 = vmatpush1.bf16.msra.mxu1 %v4073_v37 }
 0x215   :  { %2943 = vmatprep.subr.bf16.mxu1 %v4078_v38 }
 0x218   :  { %2944 = vmatpush1.bf16.msra.mxu1 %v4076_v39 }
 0x219   :  { %2945 = vmatprep.subr.bf16.mxu1 %v4081_v40 }
 0x21c   :  { %2946 = vmatpush1.bf16.msra.mxu1 %v4079_v41 }
 0x21d   :  { %2947 = vmatprep.subr.bf16.mxu1 %v4084_v43 }
 0x220   :  { %2948 = vmatpush1.bf16.msra.mxu1 %v4082_v44 }
 0x221   :  { %2949 = vmatprep.subr.bf16.mxu1 %v4087_v45 }
 0x224   :  { %2950 = vmatpush1.bf16.msra.mxu1 %v4085_v47 }
 0x225   :  { %2951 = vmatprep.subr.bf16.mxu1 %v4090_v49 }
 0x228   :  { %2952 = vmatpush1.bf16.msra.mxu1 %v4088_v50  ;;  %v3014_v50 = vsub.s32 0, %v4290_v46 }
 0x229   :  { %2953 = vmatprep.subr.bf16.mxu1 %v4093_v51  ;;  %v3018_v51 = vsub.s32 1, %v4290_v46 }
 0x22c   :  { %2954 = vmatpush1.bf16.msra.mxu1 %v4091_v52  ;;  %v3022_v52 = vsub.s32 2, %v4290_v46 }
 0x22d   :  { %2955 = vmatprep.subr.bf16.mxu1 %v4096_v54  ;;  %v3026_v54 = vsub.s32 3, %v4290_v46 }
 0x230   :  { %2956 = vmatpush2.bf16.msra.mxu1 %v4094_v55  ;;  %v3010_v55 = vld [vmem:[%s4411_s3] sm:$0xf] }
 0x231   :  { %2957 = vmatprep.subr.bf16.mxu1 %v4099_v56  ;;  %v3036_v56 = vld [vmem:[#allocation8] sm:$0xf] }
 0x234   :  { %2958 = vmatpush2.bf16.msra.mxu1 %v4097_v57  ;;  %v3015_v57 = vrot.slane %v3010_v55, %v3014_v50 }
 0x235   :  { %2959 = vmatprep.subr.bf16.mxu1 %v4102_v58  ;;  %v3019_v58 = vrot.slane %v3010_v55, %v3018_v51 }
 0x238   :  { %2960 = vmatpush2.bf16.msra.mxu1 %v4100_v59  ;;  %v3023_v59 = vrot.slane %v3010_v55, %v3022_v52 }
 0x239   :  { %2961 = vmatprep.subr.bf16.mxu1 %v4105_v60  ;;  %v3027_v60 = vrot.slane %v3010_v55, %v3026_v54 }
 0x23c   :  { %2962 = vmatpush2.bf16.msra.mxu1 %v4103_v6 }
 0x23d   :  { %2963 = vmatprep.subr.bf16.mxu1 %v4108_v61  ;;  %v3041_v61 = vrot.slane %v3036_v56, %v3014_v50 }
 0x240   :  { %2964 = vmatpush2.bf16.msra.mxu1 %v4106_v62  ;;  %v3045_v62 = vrot.slane %v3036_v56, %v3018_v51 }
 0x241   :  { %2965 = vmatprep.subr.bf16.mxu1 %v4111_v63  ;;  %v3049_v63 = vrot.slane %v3036_v56, %v3022_v52 }
 0x244   :  { %2966 = vmatpush2.bf16.msra.mxu1 %v4109_v1 }
 0x245   :  { %2967 = vmatprep.subr.bf16.mxu1 %v4114_v3 }
 0x248   :  { %2968 = vmatpush2.bf16.msra.mxu1 %v4112_v23 }
 0x249   :  { %2969 = vmatprep.subr.bf16.mxu1 %v4117_v42 }
 0x24c   :  { %2970 = vmatpush2.bf16.msra.mxu1 %v4115_v8  ;;  %v3053_v8 = vrot.slane %v3036_v56, %v3026_v54 }
 0x24f   :  { %2972 = vmatmul.mubr.bf16.vlgmr.msra.gmra.mxu1 %v4386_v35 }
 0x252   :  { %v2850_v4 = vpop.f32.mrf.mxu0 }
 0x254   :  { %v2852_v5 = vpop.f32.mrf.mxu0 }
 0x256   :  { %v2854_v10 = vpop.f32.mrf.mxu0 }
 0x258   :  { %v2855_v11 = vpop.f32.mrf.mxu0 }
 0x292   :  { %v2932_v0 = vpop.f32.mrf.mxu0 }
 0x294   :  { %v2934_v22 = vpop.f32.mrf.mxu0 }
 0x296   :  { %v2936_v9 = vpop.f32.mrf.mxu0 }
 0x298   :  { %v2937_v12 = vpop.f32.mrf.mxu0 }
 0x2cf   :  { %v2891_v2 = vpop.f32.mrf.mxu1 }
 0x2d0   :  { %v2892_v18 = vadd.f32 %v2891_v2, %v2850_v4 }
 0x2d1   :  { %v2893_v13 = vpop.f32.mrf.mxu1 }
 0x2d2   :  { %v2894_v17 = vadd.f32 %v2893_v13, %v2852_v5  ;;  %v2980_v24 = vadd.f32 %v2892_v18, %v4366_v48 }
 0x2d3   :  { %v2895_v15 = vpop.f32.mrf.mxu1 }
 0x2d4   :  { %v2981_v20 = vadd.f32 %v2894_v17, %v4369_v7 }
 0x2d5   :  { %v2896_v16 = vpop.f32.mrf.mxu1 }
 0x2d6   :  { %v2984_v29 = vadd.f32 %v2981_v20, %v2980_v24 }
 0x30f   :  { %v2973_v21 = vpop.f32.mrf.mxu1 }
 0x310   :  { %v2974_v25 = vadd.f32 %v2973_v21, %v2932_v0 }
 0x311   :  { %v2975_v26 = vpop.f32.mrf.mxu1 }
 0x312   :  { %v2982_v27 = vadd.f32 %v2974_v25, %v4378_v14  ;;  %v2976_v28 = vadd.f32 %v2975_v26, %v2934_v22 }
 0x313   :  { %v2977_v30 = vpop.f32.mrf.mxu1 }
 0x314   :  { %v2983_v31 = vadd.f32 %v2976_v28, %v4381_v19  ;;  %v2985_v32 = vadd.f32 %v2984_v29, %v2982_v27 }
 0x315   :  { %v2978_v33 = vpop.f32.mrf.mxu1 }
 0x316   :  { %v2986_v34 = vadd.f32 %v2985_v32, %v2983_v31 }
 0x318   :  { %2987 = vadd.xlane.f32.xlu0 %v2986_v34 }
 0x3a1   :  { %v2988_v35 = vpop.xlane.xlu0 %2987 }
 0x3a2   :  { %v2989_v36 = vmul.f32 0.001953125, %v2988_v35 }
 0x3a4   :  { %v2990_v37 = vsub.f32 %v2980_v24, %v2989_v36  ;;  %v2991_v7 = vsub.f32 %v2981_v20, %v2989_v36  ;;  %v2992_v38 = vsub.f32 %v2982_v27, %v2989_v36  ;;  %v2993_v39 = vsub.f32 %v2983_v31, %v2989_v36 }
 0x3a6   :  { %v2994_v48 = vmul.f32 %v2990_v37, %v2990_v37  ;;  %v2995_v40 = vmul.f32 %v2991_v7, %v2991_v7  ;;  %v2996_v41 = vmul.f32 %v2992_v38, %v2992_v38  ;;  %v2997_v14 = vmul.f32 %v2993_v39, %v2993_v39 }
 0x3a8   :  { %v2998_v43 = vadd.f32 %v2995_v40, %v2994_v48 }
 0x3aa   :  { %v2999_v44 = vadd.f32 %v2998_v43, %v2996_v41 }
 0x3ac   :  { %v3000_v45 = vadd.f32 %v2999_v44, %v2997_v14 }
 0x3ae   :  { %3001 = vadd.xlane.f32.xlu0 %v3000_v45 }
 0x437   :  { %v3002_v47 = vpop.xlane.xlu0 %3001 }
 0x438   :  { %v3003_v19 = vmul.f32 0.001953125, %v3002_v47 }
 0x43a   :  { %v3004_v49 = vadd.f32 1e-05, %v3003_v19 }
 0x43c   :  { %4126 = vrsqrt.f32 %v3004_v49 }
 0x449   :  { %v4127_v6 = vpop.eup %4126 }
 0x44a   :  { %v3006_v1 = vmul.f32 %v4127_v6, %v2990_v37  ;;  %v3007_v3 = vmul.f32 %v4127_v6, %v2991_v7  ;;  %v3008_v23 = vmul.f32 %v4127_v6, %v2992_v38  ;;  %v3009_v42 = vmul.f32 %v4127_v6, %v2993_v39 }
 0x44c   :  { %v3032_v4 = vmul.f32 %v3015_v57, %v3006_v1  ;;  %v3033_v46 = vmul.f32 %v3019_v58, %v3007_v3  ;;  %v3034_v5 = vmul.f32 %v3023_v59, %v3008_v23  ;;  %v3035_v10 = vmul.f32 %v3027_v60, %v3009_v42 }
 0x44e   :  { %v3058_v11 = vadd.f32 %v3041_v61, %v3032_v4  ;;  %v3059_v0 = vadd.f32 %v3045_v62, %v3033_v46  ;;  %v3060_v22 = vadd.f32 %v3049_v63, %v3034_v5  ;;  %v3061_v9 = vadd.f32 %v3053_v8, %v3035_v10 }
 0x450   :  { %v3062_v12 = vmul.f32 %v3058_v11, %v3058_v11  ;;  %v3063_v2 = vmul.f32 %v3059_v0, %v3059_v0  ;;  %v3064_v13 = vmul.f32 %v3060_v22, %v3060_v22  ;;  %v3065_v16 = vmul.f32 %v3061_v9, %v3061_v9 }
 0x452   :  { %v3066_v15 = vadd.f32 %v3063_v2, %v3062_v12 }
 0x454   :  { %v3067_v17 = vadd.f32 %v3066_v15, %v3064_v13 }
 0x456   :  { %v3068_v18 = vadd.f32 %v3067_v17, %v3065_v16 }
 0x458   :  { %3069 = vadd.xlane.f32.xlu1 %v3068_v18 }
 0x4e1   :  { %v3070_v20 = vpop.xlane.xlu1 %3069 }
 0x4e2   :  { %v3071_v21 = vmax.f32 %v3070_v20, 1e-12 }
 0x4e4   :  { %4128 = vrsqrt.f32 %v3071_v21 }
 0x4f1   :  { %v4129_v24 = vpop.eup %4128 }
 0x4f2   :  { %v3073_v25 = vmul.f32 %v4129_v24, %v3058_v11  ;;  %v3074_v26 = vmul.f32 %v4129_v24, %v3059_v0  ;;  %v3075_v27 = vmul.f32 %v4129_v24, %v3060_v22  ;;  %v3076_v28 = vmul.f32 %v4129_v24, %v3061_v9 }
 0x4f4   :  { %v3081_v29 = vcombine.low %v3073_v25, %v3074_v26  ;;  %v3082_v30 = vcombine.high %v3073_v25, %v3074_v26  ;;  %v3083_v31 = vcombine.low %v3075_v27, %v3076_v28  ;;  %v3084_v32 = vcombine.high %v3075_v27, %v3076_v28 }
 0x4f6   :  { %v3091_v33 = vrot.slane %v3081_v29, %v4293_v53  ;;  %v3098_v34 = vrot.slane %v3082_v30, %v4293_v53  ;;  %v3105_v35 = vrot.slane %v3083_v31, %v4293_v53  ;;  %v3112_v36 = vrot.slane %v3084_v32, %v4293_v53 }
 0x4f8   :  { %v3113_v37 = vcombine.low %v3091_v33, %v3105_v35  ;;  %v3114_v7 = vcombine.high %v3091_v33, %v3105_v35  ;;  %v3115_v38 = vcombine.low %v3098_v34, %v3112_v36  ;;  %v3116_v39 = vcombine.high %v3098_v34, %v3112_v36 }
 0x4fa   :  { %3121 = vst [vmem:[#allocation10] sm:$0xff] %v3113_v37  ;;  %3122 = vst [vmem:[#allocation10 + $0x8] sm:$0xff] %v3114_v7 }
 0x4fb   :  { %3123 = vst [vmem:[#allocation10 + $0x10] sm:$0xff] %v3115_v38  ;;  %3124 = vst [vmem:[#allocation10 + $0x18] sm:$0xff] %v3116_v39 }
 0x4fc   :  { %3129 = vsyncadd [#allocation4], 384  ;;  %s4245_s3 = smov [#allocation10]  }
 0x4fd   :  { %s3130_s14 = sshll.u32 %s4245_s3, 4  ;;  %s3131_s14 = int_to_ptr.vmem [resolvable:$true] %s3130_s14 }
 0x4fe   :  { %s4210_s15 = scalar_lea.vmem %s3131_s14, 128  ;;  %s4214_s16 = scalar_lea.vmem %s3131_s14, 512 }
 0x4ff   :  { %p4211_p6 = scmp.ne.s32.totalorder %s3131_s14, %s4210_s15  ;;  %p4215_p7 = scmp.lt.s32.totalorder %s3131_s14, %s3131_s14 }
 0x500   :  { %p4216_p8 = scmp.lt.s32.totalorder %s4214_s16, %s4210_s15 }
 0x502   :  { %p4217_p9 = por %p4216_p8, %p4215_p7 }
 0x504   :  { %p4218_p10 = pnand %p4217_p9, %p4211_p6 }
 0x506   :  { %4221 = shalt.err (!%p4218_p10)
}
 0x507   :  { %s4246_s17 = smov 128   ;;  %s4247_s18 = smov 8  }
 0x508   :  { %3136 = dma.vmem_to_hbm [thread:$0]  %s3131_s14, 128, %s4413_s5, [#allocation4], %s4246_s17, %s4246_s17, %s4247_s18  }
 0x509   :  { %4236 = dma.done.wait [#allocation4], 512  }
 0x50a   :  { %4237 = vsyncadd [#allocation4], 4294966784 }
 0x50b   :  { %3140 = vsyncpa [#allocation3], 1 }
 0x50c   :  { %3141 = vsyncpa [#allocation6], 1 }
 0x50d   :  { %3142 = vsyncpa [#allocation9], 1 }
 0x50e   :  { %3143 = vsyncpa [#allocation4], 1 }

</bundles_post_ra>
